<compile_context>
chip_gen: v5e
topology: v5e:2x2
jax: 0.10.0
libtpu: 0.0.40
codegen_flags: <defaults>
</compile_context>

<pallas_src>
import jax
import jax.numpy as jnp
from jax import lax
from jax.experimental import pallas as pl
from jax.experimental.pallas import tpu as pltpu

# ---- problem sizes (small, consistent with the module) ----
BATCH = 2
SEQ = 8
INPUT_DIM = 16
HIDDEN = 32
PREDICT_STEPS = 8
OUT_DIM = 10
OUT_PAD = 128                    # padded lane width for unmasked output store


# ----------------------------------------------------------------------------
# Single fused kernel: hoisted x-projection + 2-layer LSTM (unrolled) + heads.
# ----------------------------------------------------------------------------
def fused_kernel(x_ref, lstm_wb_ref, head1_ref, head2_ref, out_ref):
    B, T, D, H, P = BATCH, SEQ, INPUT_DIM, HIDDEN, PREDICT_STEPS

    # ---- packed LSTM weights / biases (g-gate columns pre-scaled by 2) ----
    lw = lstm_wb_ref[...]                       # (D + 3H + 2, 4H) = (114, 128)
    wih0 = lw[0:D, :]                           # (16, 128)
    whh0 = lw[D:D + H, :]                       # (32, 128)
    wih1 = lw[D + H:D + 2 * H, :]               # (32, 128)
    whh1 = lw[D + 2 * H:D + 3 * H, :]           # (32, 128)
    b0 = jnp.broadcast_to(lw[D + 3 * H:D + 3 * H + 1, :], (T * B, 4 * H))
    b1 = jnp.broadcast_to(lw[D + 3 * H + 1:D + 3 * H + 2, :], (B, 4 * H))

    # ---- hoisted layer-0 input projection: one MXU push, bias folded in ----
    x_proj = jnp.dot(x_ref[...], wih0,
                     preferred_element_type=jnp.float32) + b0      # (T*B, 4H)

    def gates_to_state(gates, c):
        sg = jax.nn.sigmoid(gates)              # single full-width EUP pass
        i = sg[:, 0 * H:1 * H]
        f = sg[:, 1 * H:2 * H]
        g = 2.0 * sg[:, 2 * H:3 * H] - 1.0      # tanh(x) = 2*sigmoid(2x) - 1
        o = sg[:, 3 * H:4 * H]
        c_new = f * c + i * g
        h_new = o * jnp.tanh(c_new)             # second (and last) EUP pass
        return h_new, c_new

    h0 = jnp.zeros((B, H), jnp.float32)
    c0 = jnp.zeros((B, H), jnp.float32)
    h1 = jnp.zeros((B, H), jnp.float32)
    c1 = jnp.zeros((B, H), jnp.float32)

    # Static, fully-unrolled time loop (T = 8); no concats on the serial chain.
    for t in range(T):
        g0 = x_proj[t * B:(t + 1) * B, :] + jnp.dot(
            h0, whh0, preferred_element_type=jnp.float32)
        h0, c0 = gates_to_state(g0, c0)
        g1 = (jnp.dot(h0, wih1, preferred_element_type=jnp.float32)
              + jnp.dot(h1, whh1, preferred_element_type=jnp.float32) + b1)
        h1, c1 = gates_to_state(g1, c1)

    # ---- heads: z = relu(h1 @ W1_cat + b1_cat); out = z @ W2_blockdiag + b2 ----
    hd1 = head1_ref[...]                        # (H + 1, P*H) = (33, 256)
    hw1 = hd1[0:H, :]
    hb1 = jnp.broadcast_to(hd1[H:H + 1, :], (B, P * H))
    hd2 = head2_ref[...]                        # (P*H + 1, 128) = (257, 128)
    hw2 = hd2[0:P * H, :]
    hb2 = jnp.broadcast_to(hd2[P * H:P * H + 1, :], (B, OUT_PAD))

    z = jnp.maximum(jnp.dot(h1, hw1, preferred_element_type=jnp.float32) + hb1,
                    0.0)                        # ReLU (dropout = identity)
    # Lane-dense (B, 128) unmasked store; cols 80:128 are zero padding.
    out_ref[...] = jnp.dot(z, hw2, preferred_element_type=jnp.float32) + hb2


def _full_spec(shape):
    return pl.BlockSpec(shape, lambda i: (0,) * len(shape))


def run_fused(x_tm, lstm_wb, head1, head2):
    return pl.pallas_call(
        fused_kernel,
        out_shape=jax.ShapeDtypeStruct((BATCH, OUT_PAD), jnp.float32),
        grid_spec=pltpu.PrefetchScalarGridSpec(
            num_scalar_prefetch=0,
            grid=(1,),
            in_specs=[
                _full_spec(x_tm.shape),
                _full_spec(lstm_wb.shape),
                _full_spec(head1.shape),
                _full_spec(head2.shape),
            ],
            out_specs=_full_spec((BATCH, OUT_PAD)),
        ),
        compiler_params=pltpu.CompilerParams(
            dimension_semantics=("arbitrary",)),
    )(x_tm, lstm_wb, head1, head2)


# ----------------------------------------------------------------------------
# Parameter construction (PyTorch layout) and fused-weight preparation.
# ----------------------------------------------------------------------------
def init_params(key):
    k = 1.0 / jnp.sqrt(jnp.float32(HIDDEN))
    keys = jax.random.split(key, 16)
    u = lambda kk, shape: jax.random.uniform(kk, shape, jnp.float32, -k, k)
    return {
        # LSTM layer 0 (PyTorch shapes: w_ih (4H, D), w_hh (4H, H), biases (4H,))
        "wih0": u(keys[0], (4 * HIDDEN, INPUT_DIM)),
        "whh0": u(keys[1], (4 * HIDDEN, HIDDEN)),
        "bih0": u(keys[2], (4 * HIDDEN,)),
        "bhh0": u(keys[3], (4 * HIDDEN,)),
        # LSTM layer 1
        "wih1": u(keys[4], (4 * HIDDEN, HIDDEN)),
        "whh1": u(keys[5], (4 * HIDDEN, HIDDEN)),
        "bih1": u(keys[6], (4 * HIDDEN,)),
        "bhh1": u(keys[7], (4 * HIDDEN,)),
        # Heads: PREDICT_STEPS x [Linear(H,H), Linear(H,10)] (out_features, in_features)
        "hw1": u(keys[8], (PREDICT_STEPS, HIDDEN, HIDDEN)),
        "hb1": u(keys[9], (PREDICT_STEPS, HIDDEN)),
        "hw2": u(keys[10], (PREDICT_STEPS, OUT_DIM, HIDDEN)),
        "hb2": u(keys[11], (PREDICT_STEPS, OUT_DIM)),
    }


def prepare_fused_params(params):
    """One-time weight repacking (off the per-call hot path)."""
    H, P, K, D = HIDDEN, PREDICT_STEPS, OUT_DIM, INPUT_DIM

    # Scale the g-gate column block (cols 2H:3H in PyTorch [i,f,g,o] order) by 2
    # so the kernel can use tanh(x) = 2*sigmoid(2x) - 1 with a single sigmoid.
    scale = jnp.ones((4 * H,), jnp.float32).at[2 * H:3 * H].set(2.0)

    wih0 = params["wih0"].T * scale                      # (D, 4H)
    whh0 = params["whh0"].T * scale                      # (H, 4H)
    wih1 = params["wih1"].T * scale                      # (H, 4H)
    whh1 = params["whh1"].T * scale                      # (H, 4H)
    b0 = ((params["bih0"] + params["bhh0"]) * scale)[None, :]   # (1, 4H)
    b1 = ((params["bih1"] + params["bhh1"]) * scale)[None, :]   # (1, 4H)
    lstm_wb = jnp.concatenate([wih0, whh0, wih1, whh1, b0, b1], axis=0)  # (114,128)

    # Heads layer 1: concat all heads along the output dim -> (H, P*H), + bias row.
    hw1 = jnp.transpose(params["hw1"], (2, 0, 1)).reshape(H, P * H)      # (32, 256)
    hb1 = params["hb1"].reshape(1, P * H)
    head1 = jnp.concatenate([hw1, hb1], axis=0)                          # (33, 256)

    # Heads layer 2: block-diagonal (P*H, P*K); block p = hw2[p].T.  Pad lanes
    # 80 -> 128 (zeros) so the kernel's output store is unmasked, + bias row.
    eye = jnp.eye(P, dtype=jnp.float32)
    hw2 = jnp.einsum("pq,poi->piqo", eye, params["hw2"]).reshape(P * H, P * K)
    hb2 = params["hb2"].reshape(1, P * K)
    hw2p = jnp.pad(hw2, ((0, 0), (0, OUT_PAD - P * K)))
    hb2p = jnp.pad(hb2, ((0, 0), (0, OUT_PAD - P * K)))
    head2 = jnp.concatenate([hw2p, hb2p], axis=0)                        # (257, 128)

    return {"lstm_wb": lstm_wb, "head1": head1, "head2": head2}


@jax.jit
def forward(x, fused):
    # x: (B, T, INPUT_DIM), batch_first like PyTorch.  Time-major reshape for
    # the hoisted x-projection happens here (tiny XLA op, outside the kernel).
    B, T, D = x.shape
    x_tm = jnp.swapaxes(x.astype(jnp.float32), 0, 1).reshape(T * B, D)
    out = run_fused(x_tm, fused["lstm_wb"], fused["head1"], fused["head2"])
    # (B, 128) -> (B, P*10) -> (B, P, 10) == torch.stack(predictions, dim=1)
    return out[:, :PREDICT_STEPS * OUT_DIM].reshape(B, PREDICT_STEPS, OUT_DIM)


# ----------------------------------------------------------------------------
# Pure-JAX reference for correctness checking.
# ----------------------------------------------------------------------------
def reference_forward(x, params):
    def run_layer(inp, w_ih, w_hh, b):
        B = inp.shape[0]
        h = jnp.zeros((B, HIDDEN), jnp.float32)
        c = jnp.zeros((B, HIDDEN), jnp.float32)

        def step(carry, x_t):
            h, c = carry
            gates = x_t @ w_ih.T + h @ w_hh.T + b
            i, f, g, o = jnp.split(gates, 4, axis=-1)
            i = jax.nn.sigmoid(i)
            f = jax.nn.sigmoid(f)
            g = jnp.tanh(g)
            o = jax.nn.sigmoid(o)
            c = f * c + i * g
            h = o * jnp.tanh(c)
            return (h, c), h

        (h, c), hs = lax.scan(step, (h, c), jnp.swapaxes(inp, 0, 1))
        return jnp.swapaxes(hs, 0, 1), h

    b0 = params["bih0"] + params["bhh0"]
    b1 = params["bih1"] + params["bhh1"]
    seq0, _ = run_layer(x, params["wih0"], params["whh0"], b0)
    _, h_last = run_layer(seq0, params["wih1"], params["whh1"], b1)

    z = jnp.einsum("bh,pkh->pbk", h_last, params["hw1"]) + params["hb1"][:, None, :]
    z = jnp.maximum(z, 0.0)
    out = jnp.einsum("pbh,pkh->pbk", z, params["hw2"]) + params["hb2"][:, None, :]
    return jnp.transpose(out, (1, 0, 2))


if __name__ == "__main__":
    key = jax.random.PRNGKey(0)
    pkey, xkey = jax.random.split(key)
    params = init_params(pkey)
    fused = prepare_fused_params(params)
    x = jax.random.normal(xkey, (BATCH, SEQ, INPUT_DIM), jnp.float32)

    out = forward(x, fused)
    out = jax.block_until_ready(out)

    ref = reference_forward(x, params)
    assert out.shape == (BATCH, PREDICT_STEPS, OUT_DIM), out.shape
    assert jnp.allclose(out, ref, atol=1e-4, rtol=1e-4), float(
        jnp.max(jnp.abs(out - ref)))

    print("KERNEL_OK")
</pallas_src>

<mosaic_0001>
module attributes {stable_mosaic.version = 11 : i64} {
  func.func @fused_kernel(%arg0: i32, %arg1: memref<16x16xf32, #tpu.memory_space<vmem>>, %arg2: memref<114x128xf32, #tpu.memory_space<vmem>>, %arg3: memref<33x256xf32, #tpu.memory_space<vmem>>, %arg4: memref<257x128xf32, #tpu.memory_space<vmem>>, %arg5: memref<2x128xf32, #tpu.memory_space<vmem>>) attributes {dimension_semantics = [#tpu.dimension_semantics<arbitrary>], iteration_bounds = array<i64: 1>, scalar_prefetch = 0 : i64, scratch_operands = 0 : i64, tpu.core_type = #tpu.core_type<tc>, window_params = [{pipeline_mode = #tpu.pipeline_mode<synchronous>, transform_indices = @transform_0, window_bounds = array<i64: 16, 16>}, {pipeline_mode = #tpu.pipeline_mode<synchronous>, transform_indices = @transform_1, window_bounds = array<i64: 114, 128>}, {pipeline_mode = #tpu.pipeline_mode<synchronous>, transform_indices = @transform_2, window_bounds = array<i64: 33, 256>}, {pipeline_mode = #tpu.pipeline_mode<synchronous>, transform_indices = @transform_3, window_bounds = array<i64: 257, 128>}, {pipeline_mode = #tpu.pipeline_mode<synchronous>, transform_indices = @transform_4, window_bounds = array<i64: 2, 128>}]} {
    %c0 = arith.constant 0 : index
    %c0_0 = arith.constant 0 : index
    %0 = vector.load %arg2[%c0, %c0_0] : memref<114x128xf32, #tpu.memory_space<vmem>>, vector<114x128xf32>
    %1 = vector.extract_strided_slice %0 {offsets = [0, 0], sizes = [16, 128], strides = [1, 1]} : vector<114x128xf32> to vector<16x128xf32>
    %2 = vector.extract_strided_slice %0 {offsets = [16, 0], sizes = [32, 128], strides = [1, 1]} : vector<114x128xf32> to vector<32x128xf32>
    %3 = vector.extract_strided_slice %0 {offsets = [48, 0], sizes = [32, 128], strides = [1, 1]} : vector<114x128xf32> to vector<32x128xf32>
    %4 = vector.extract_strided_slice %0 {offsets = [80, 0], sizes = [32, 128], strides = [1, 1]} : vector<114x128xf32> to vector<32x128xf32>
    %5 = vector.extract_strided_slice %0 {offsets = [112, 0], sizes = [1, 128], strides = [1, 1]} : vector<114x128xf32> to vector<1x128xf32>
    %6 = vector.shape_cast %5 : vector<1x128xf32> to vector<1x128xf32>
    %7 = vector.broadcast %6 : vector<1x128xf32> to vector<16x128xf32>
    %8 = vector.extract_strided_slice %0 {offsets = [113, 0], sizes = [1, 128], strides = [1, 1]} : vector<114x128xf32> to vector<1x128xf32>
    %9 = vector.shape_cast %8 : vector<1x128xf32> to vector<1x128xf32>
    %10 = vector.broadcast %9 : vector<1x128xf32> to vector<2x128xf32>
    %c0_1 = arith.constant 0 : index
    %c0_2 = arith.constant 0 : index
    %11 = vector.load %arg1[%c0_1, %c0_2] : memref<16x16xf32, #tpu.memory_space<vmem>>, vector<16x16xf32>
    %cst = arith.constant dense<0.000000e+00> : vector<16x128xf32>
    %12 = tpu.matmul %11, %1, %cst {dimension_numbers = #tpu.dot_dimension_numbers<[1], [0], [0], [1], [0, 0, 1, 1], [], []>} : vector<16x16xf32>, vector<16x128xf32>, vector<16x128xf32> -> vector<16x128xf32>
    %13 = arith.addf %12, %7 : vector<16x128xf32>
    %cst_3 = arith.constant 0.000000e+00 : f32
    %14 = vector.broadcast %cst_3 : f32 to vector<2x32xf32>
    %cst_4 = arith.constant 0.000000e+00 : f32
    %15 = vector.broadcast %cst_4 : f32 to vector<2x32xf32>
    %cst_5 = arith.constant 0.000000e+00 : f32
    %16 = vector.broadcast %cst_5 : f32 to vector<2x32xf32>
    %cst_6 = arith.constant 0.000000e+00 : f32
    %17 = vector.broadcast %cst_6 : f32 to vector<2x32xf32>
    %18 = vector.extract_strided_slice %13 {offsets = [0, 0], sizes = [2, 128], strides = [1, 1]} : vector<16x128xf32> to vector<2x128xf32>
    %cst_7 = arith.constant dense<0.000000e+00> : vector<2x128xf32>
    %19 = tpu.matmul %14, %2, %cst_7 {dimension_numbers = #tpu.dot_dimension_numbers<[1], [0], [0], [1], [0, 0, 1, 1], [], []>} : vector<2x32xf32>, vector<32x128xf32>, vector<2x128xf32> -> vector<2x128xf32>
    %20 = arith.addf %18, %19 : vector<2x128xf32>
    %21 = arith.negf %20 : vector<2x128xf32>
    %22 = math.exp %21 : vector<2x128xf32>
    %cst_8 = arith.constant 1.000000e+00 : f32
    %23 = vector.broadcast %cst_8 : f32 to vector<2x128xf32>
    %24 = arith.addf %23, %22 : vector<2x128xf32>
    %25 = arith.divf %23, %24 : vector<2x128xf32>
    %26 = vector.extract_strided_slice %25 {offsets = [0, 0], sizes = [2, 32], strides = [1, 1]} : vector<2x128xf32> to vector<2x32xf32>
    %27 = vector.extract_strided_slice %25 {offsets = [0, 32], sizes = [2, 32], strides = [1, 1]} : vector<2x128xf32> to vector<2x32xf32>
    %28 = vector.extract_strided_slice %25 {offsets = [0, 64], sizes = [2, 32], strides = [1, 1]} : vector<2x128xf32> to vector<2x32xf32>
    %cst_9 = arith.constant 2.000000e+00 : f32
    %29 = vector.broadcast %cst_9 : f32 to vector<2x32xf32>
    %30 = arith.mulf %29, %28 : vector<2x32xf32>
    %cst_10 = arith.constant 1.000000e+00 : f32
    %31 = vector.broadcast %cst_10 : f32 to vector<2x32xf32>
    %32 = arith.subf %30, %31 : vector<2x32xf32>
    %33 = vector.extract_strided_slice %25 {offsets = [0, 96], sizes = [2, 32], strides = [1, 1]} : vector<2x128xf32> to vector<2x32xf32>
    %34 = arith.mulf %27, %15 : vector<2x32xf32>
    %35 = arith.mulf %26, %32 : vector<2x32xf32>
    %36 = arith.addf %34, %35 : vector<2x32xf32>
    %37 = math.tanh %36 : vector<2x32xf32>
    %38 = arith.mulf %33, %37 : vector<2x32xf32>
    %cst_11 = arith.constant dense<0.000000e+00> : vector<2x128xf32>
    %39 = tpu.matmul %38, %3, %cst_11 {dimension_numbers = #tpu.dot_dimension_numbers<[1], [0], [0], [1], [0, 0, 1, 1], [], []>} : vector<2x32xf32>, vector<32x128xf32>, vector<2x128xf32> -> vector<2x128xf32>
    %cst_12 = arith.constant dense<0.000000e+00> : vector<2x128xf32>
    %40 = tpu.matmul %16, %4, %cst_12 {dimension_numbers = #tpu.dot_dimension_numbers<[1], [0], [0], [1], [0, 0, 1, 1], [], []>} : vector<2x32xf32>, vector<32x128xf32>, vector<2x128xf32> -> vector<2x128xf32>
    %41 = arith.addf %39, %40 : vector<2x128xf32>
    %42 = arith.addf %41, %10 : vector<2x128xf32>
    %43 = arith.negf %42 : vector<2x128xf32>
    %44 = math.exp %43 : vector<2x128xf32>
    %cst_13 = arith.constant 1.000000e+00 : f32
    %45 = vector.broadcast %cst_13 : f32 to vector<2x128xf32>
    %46 = arith.addf %45, %44 : vector<2x128xf32>
    %47 = arith.divf %45, %46 : vector<2x128xf32>
    %48 = vector.extract_strided_slice %47 {offsets = [0, 0], sizes = [2, 32], strides = [1, 1]} : vector<2x128xf32> to vector<2x32xf32>
    %49 = vector.extract_strided_slice %47 {offsets = [0, 32], sizes = [2, 32], strides = [1, 1]} : vector<2x128xf32> to vector<2x32xf32>
    %50 = vector.extract_strided_slice %47 {offsets = [0, 64], sizes = [2, 32], strides = [1, 1]} : vector<2x128xf32> to vector<2x32xf32>
    %cst_14 = arith.constant 2.000000e+00 : f32
    %51 = vector.broadcast %cst_14 : f32 to vector<2x32xf32>
    %52 = arith.mulf %51, %50 : vector<2x32xf32>
    %cst_15 = arith.constant 1.000000e+00 : f32
    %53 = vector.broadcast %cst_15 : f32 to vector<2x32xf32>
    %54 = arith.subf %52, %53 : vector<2x32xf32>
    %55 = vector.extract_strided_slice %47 {offsets = [0, 96], sizes = [2, 32], strides = [1, 1]} : vector<2x128xf32> to vector<2x32xf32>
    %56 = arith.mulf %49, %17 : vector<2x32xf32>
    %57 = arith.mulf %48, %54 : vector<2x32xf32>
    %58 = arith.addf %56, %57 : vector<2x32xf32>
    %59 = math.tanh %58 : vector<2x32xf32>
    %60 = arith.mulf %55, %59 : vector<2x32xf32>
    %61 = vector.extract_strided_slice %13 {offsets = [2, 0], sizes = [2, 128], strides = [1, 1]} : vector<16x128xf32> to vector<2x128xf32>
    %cst_16 = arith.constant dense<0.000000e+00> : vector<2x128xf32>
    %62 = tpu.matmul %38, %2, %cst_16 {dimension_numbers = #tpu.dot_dimension_numbers<[1], [0], [0], [1], [0, 0, 1, 1], [], []>} : vector<2x32xf32>, vector<32x128xf32>, vector<2x128xf32> -> vector<2x128xf32>
    %63 = arith.addf %61, %62 : vector<2x128xf32>
    %64 = arith.negf %63 : vector<2x128xf32>
    %65 = math.exp %64 : vector<2x128xf32>
    %cst_17 = arith.constant 1.000000e+00 : f32
    %66 = vector.broadcast %cst_17 : f32 to vector<2x128xf32>
    %67 = arith.addf %66, %65 : vector<2x128xf32>
    %68 = arith.divf %66, %67 : vector<2x128xf32>
    %69 = vector.extract_strided_slice %68 {offsets = [0, 0], sizes = [2, 32], strides = [1, 1]} : vector<2x128xf32> to vector<2x32xf32>
    %70 = vector.extract_strided_slice %68 {offsets = [0, 32], sizes = [2, 32], strides = [1, 1]} : vector<2x128xf32> to vector<2x32xf32>
    %71 = vector.extract_strided_slice %68 {offsets = [0, 64], sizes = [2, 32], strides = [1, 1]} : vector<2x128xf32> to vector<2x32xf32>
    %cst_18 = arith.constant 2.000000e+00 : f32
    %72 = vector.broadcast %cst_18 : f32 to vector<2x32xf32>
    %73 = arith.mulf %72, %71 : vector<2x32xf32>
    %cst_19 = arith.constant 1.000000e+00 : f32
    %74 = vector.broadcast %cst_19 : f32 to vector<2x32xf32>
    %75 = arith.subf %73, %74 : vector<2x32xf32>
    %76 = vector.extract_strided_slice %68 {offsets = [0, 96], sizes = [2, 32], strides = [1, 1]} : vector<2x128xf32> to vector<2x32xf32>
    %77 = arith.mulf %70, %36 : vector<2x32xf32>
    %78 = arith.mulf %69, %75 : vector<2x32xf32>
    %79 = arith.addf %77, %78 : vector<2x32xf32>
    %80 = math.tanh %79 : vector<2x32xf32>
    %81 = arith.mulf %76, %80 : vector<2x32xf32>
    %cst_20 = arith.constant dense<0.000000e+00> : vector<2x128xf32>
    %82 = tpu.matmul %81, %3, %cst_20 {dimension_numbers = #tpu.dot_dimension_numbers<[1], [0], [0], [1], [0, 0, 1, 1], [], []>} : vector<2x32xf32>, vector<32x128xf32>, vector<2x128xf32> -> vector<2x128xf32>
    %cst_21 = arith.constant dense<0.000000e+00> : vector<2x128xf32>
    %83 = tpu.matmul %60, %4, %cst_21 {dimension_numbers = #tpu.dot_dimension_numbers<[1], [0], [0], [1], [0, 0, 1, 1], [], []>} : vector<2x32xf32>, vector<32x128xf32>, vector<2x128xf32> -> vector<2x128xf32>
    %84 = arith.addf %82, %83 : vector<2x128xf32>
    %85 = arith.addf %84, %10 : vector<2x128xf32>
    %86 = arith.negf %85 : vector<2x128xf32>
    %87 = math.exp %86 : vector<2x128xf32>
    %cst_22 = arith.constant 1.000000e+00 : f32
    %88 = vector.broadcast %cst_22 : f32 to vector<2x128xf32>
    %89 = arith.addf %88, %87 : vector<2x128xf32>
    %90 = arith.divf %88, %89 : vector<2x128xf32>
    %91 = vector.extract_strided_slice %90 {offsets = [0, 0], sizes = [2, 32], strides = [1, 1]} : vector<2x128xf32> to vector<2x32xf32>
    %92 = vector.extract_strided_slice %90 {offsets = [0, 32], sizes = [2, 32], strides = [1, 1]} : vector<2x128xf32> to vector<2x32xf32>
    %93 = vector.extract_strided_slice %90 {offsets = [0, 64], sizes = [2, 32], strides = [1, 1]} : vector<2x128xf32> to vector<2x32xf32>
    %cst_23 = arith.constant 2.000000e+00 : f32
    %94 = vector.broadcast %cst_23 : f32 to vector<2x32xf32>
    %95 = arith.mulf %94, %93 : vector<2x32xf32>
    %cst_24 = arith.constant 1.000000e+00 : f32
    %96 = vector.broadcast %cst_24 : f32 to vector<2x32xf32>
    %97 = arith.subf %95, %96 : vector<2x32xf32>
    %98 = vector.extract_strided_slice %90 {offsets = [0, 96], sizes = [2, 32], strides = [1, 1]} : vector<2x128xf32> to vector<2x32xf32>
    %99 = arith.mulf %92, %58 : vector<2x32xf32>
    %100 = arith.mulf %91, %97 : vector<2x32xf32>
    %101 = arith.addf %99, %100 : vector<2x32xf32>
    %102 = math.tanh %101 : vector<2x32xf32>
    %103 = arith.mulf %98, %102 : vector<2x32xf32>
    %104 = vector.extract_strided_slice %13 {offsets = [4, 0], sizes = [2, 128], strides = [1, 1]} : vector<16x128xf32> to vector<2x128xf32>
    %cst_25 = arith.constant dense<0.000000e+00> : vector<2x128xf32>
    %105 = tpu.matmul %81, %2, %cst_25 {dimension_numbers = #tpu.dot_dimension_numbers<[1], [0], [0], [1], [0, 0, 1, 1], [], []>} : vector<2x32xf32>, vector<32x128xf32>, vector<2x128xf32> -> vector<2x128xf32>
    %106 = arith.addf %104, %105 : vector<2x128xf32>
    %107 = arith.negf %106 : vector<2x128xf32>
    %108 = math.exp %107 : vector<2x128xf32>
    %cst_26 = arith.constant 1.000000e+00 : f32
    %109 = vector.broadcast %cst_26 : f32 to vector<2x128xf32>
    %110 = arith.addf %109, %108 : vector<2x128xf32>
    %111 = arith.divf %109, %110 : vector<2x128xf32>
    %112 = vector.extract_strided_slice %111 {offsets = [0, 0], sizes = [2, 32], strides = [1, 1]} : vector<2x128xf32> to vector<2x32xf32>
    %113 = vector.extract_strided_slice %111 {offsets = [0, 32], sizes = [2, 32], strides = [1, 1]} : vector<2x128xf32> to vector<2x32xf32>
    %114 = vector.extract_strided_slice %111 {offsets = [0, 64], sizes = [2, 32], strides = [1, 1]} : vector<2x128xf32> to vector<2x32xf32>
    %cst_27 = arith.constant 2.000000e+00 : f32
    %115 = vector.broadcast %cst_27 : f32 to vector<2x32xf32>
    %116 = arith.mulf %115, %114 : vector<2x32xf32>
    %cst_28 = arith.constant 1.000000e+00 : f32
    %117 = vector.broadcast %cst_28 : f32 to vector<2x32xf32>
    %118 = arith.subf %116, %117 : vector<2x32xf32>
    %119 = vector.extract_strided_slice %111 {offsets = [0, 96], sizes = [2, 32], strides = [1, 1]} : vector<2x128xf32> to vector<2x32xf32>
    %120 = arith.mulf %113, %79 : vector<2x32xf32>
    %121 = arith.mulf %112, %118 : vector<2x32xf32>
    %122 = arith.addf %120, %121 : vector<2x32xf32>
    %123 = math.tanh %122 : vector<2x32xf32>
    %124 = arith.mulf %119, %123 : vector<2x32xf32>
    %cst_29 = arith.constant dense<0.000000e+00> : vector<2x128xf32>
    %125 = tpu.matmul %124, %3, %cst_29 {dimension_numbers = #tpu.dot_dimension_numbers<[1], [0], [0], [1], [0, 0, 1, 1], [], []>} : vector<2x32xf32>, vector<32x128xf32>, vector<2x128xf32> -> vector<2x128xf32>
    %cst_30 = arith.constant dense<0.000000e+00> : vector<2x128xf32>
    %126 = tpu.matmul %103, %4, %cst_30 {dimension_numbers = #tpu.dot_dimension_numbers<[1], [0], [0], [1], [0, 0, 1, 1], [], []>} : vector<2x32xf32>, vector<32x128xf32>, vector<2x128xf32> -> vector<2x128xf32>
    %127 = arith.addf %125, %126 : vector<2x128xf32>
    %128 = arith.addf %127, %10 : vector<2x128xf32>
    %129 = arith.negf %128 : vector<2x128xf32>
    %130 = math.exp %129 : vector<2x128xf32>
    %cst_31 = arith.constant 1.000000e+00 : f32
    %131 = vector.broadcast %cst_31 : f32 to vector<2x128xf32>
    %132 = arith.addf %131, %130 : vector<2x128xf32>
    %133 = arith.divf %131, %132 : vector<2x128xf32>
    %134 = vector.extract_strided_slice %133 {offsets = [0, 0], sizes = [2, 32], strides = [1, 1]} : vector<2x128xf32> to vector<2x32xf32>
    %135 = vector.extract_strided_slice %133 {offsets = [0, 32], sizes = [2, 32], strides = [1, 1]} : vector<2x128xf32> to vector<2x32xf32>
    %136 = vector.extract_strided_slice %133 {offsets = [0, 64], sizes = [2, 32], strides = [1, 1]} : vector<2x128xf32> to vector<2x32xf32>
    %cst_32 = arith.constant 2.000000e+00 : f32
    %137 = vector.broadcast %cst_32 : f32 to vector<2x32xf32>
    %138 = arith.mulf %137, %136 : vector<2x32xf32>
    %cst_33 = arith.constant 1.000000e+00 : f32
    %139 = vector.broadcast %cst_33 : f32 to vector<2x32xf32>
    %140 = arith.subf %138, %139 : vector<2x32xf32>
    %141 = vector.extract_strided_slice %133 {offsets = [0, 96], sizes = [2, 32], strides = [1, 1]} : vector<2x128xf32> to vector<2x32xf32>
    %142 = arith.mulf %135, %101 : vector<2x32xf32>
    %143 = arith.mulf %134, %140 : vector<2x32xf32>
    %144 = arith.addf %142, %143 : vector<2x32xf32>
    %145 = math.tanh %144 : vector<2x32xf32>
    %146 = arith.mulf %141, %145 : vector<2x32xf32>
    %147 = vector.extract_strided_slice %13 {offsets = [6, 0], sizes = [2, 128], strides = [1, 1]} : vector<16x128xf32> to vector<2x128xf32>
    %cst_34 = arith.constant dense<0.000000e+00> : vector<2x128xf32>
    %148 = tpu.matmul %124, %2, %cst_34 {dimension_numbers = #tpu.dot_dimension_numbers<[1], [0], [0], [1], [0, 0, 1, 1], [], []>} : vector<2x32xf32>, vector<32x128xf32>, vector<2x128xf32> -> vector<2x128xf32>
    %149 = arith.addf %147, %148 : vector<2x128xf32>
    %150 = arith.negf %149 : vector<2x128xf32>
    %151 = math.exp %150 : vector<2x128xf32>
    %cst_35 = arith.constant 1.000000e+00 : f32
    %152 = vector.broadcast %cst_35 : f32 to vector<2x128xf32>
    %153 = arith.addf %152, %151 : vector<2x128xf32>
    %154 = arith.divf %152, %153 : vector<2x128xf32>
    %155 = vector.extract_strided_slice %154 {offsets = [0, 0], sizes = [2, 32], strides = [1, 1]} : vector<2x128xf32> to vector<2x32xf32>
    %156 = vector.extract_strided_slice %154 {offsets = [0, 32], sizes = [2, 32], strides = [1, 1]} : vector<2x128xf32> to vector<2x32xf32>
    %157 = vector.extract_strided_slice %154 {offsets = [0, 64], sizes = [2, 32], strides = [1, 1]} : vector<2x128xf32> to vector<2x32xf32>
    %cst_36 = arith.constant 2.000000e+00 : f32
    %158 = vector.broadcast %cst_36 : f32 to vector<2x32xf32>
    %159 = arith.mulf %158, %157 : vector<2x32xf32>
    %cst_37 = arith.constant 1.000000e+00 : f32
    %160 = vector.broadcast %cst_37 : f32 to vector<2x32xf32>
    %161 = arith.subf %159, %160 : vector<2x32xf32>
    %162 = vector.extract_strided_slice %154 {offsets = [0, 96], sizes = [2, 32], strides = [1, 1]} : vector<2x128xf32> to vector<2x32xf32>
    %163 = arith.mulf %156, %122 : vector<2x32xf32>
    %164 = arith.mulf %155, %161 : vector<2x32xf32>
    %165 = arith.addf %163, %164 : vector<2x32xf32>
    %166 = math.tanh %165 : vector<2x32xf32>
    %167 = arith.mulf %162, %166 : vector<2x32xf32>
    %cst_38 = arith.constant dense<0.000000e+00> : vector<2x128xf32>
    %168 = tpu.matmul %167, %3, %cst_38 {dimension_numbers = #tpu.dot_dimension_numbers<[1], [0], [0], [1], [0, 0, 1, 1], [], []>} : vector<2x32xf32>, vector<32x128xf32>, vector<2x128xf32> -> vector<2x128xf32>
    %cst_39 = arith.constant dense<0.000000e+00> : vector<2x128xf32>
    %169 = tpu.matmul %146, %4, %cst_39 {dimension_numbers = #tpu.dot_dimension_numbers<[1], [0], [0], [1], [0, 0, 1, 1], [], []>} : vector<2x32xf32>, vector<32x128xf32>, vector<2x128xf32> -> vector<2x128xf32>
    %170 = arith.addf %168, %169 : vector<2x128xf32>
    %171 = arith.addf %170, %10 : vector<2x128xf32>
    %172 = arith.negf %171 : vector<2x128xf32>
    %173 = math.exp %172 : vector<2x128xf32>
    %cst_40 = arith.constant 1.000000e+00 : f32
    %174 = vector.broadcast %cst_40 : f32 to vector<2x128xf32>
    %175 = arith.addf %174, %173 : vector<2x128xf32>
    %176 = arith.divf %174, %175 : vector<2x128xf32>
    %177 = vector.extract_strided_slice %176 {offsets = [0, 0], sizes = [2, 32], strides = [1, 1]} : vector<2x128xf32> to vector<2x32xf32>
    %178 = vector.extract_strided_slice %176 {offsets = [0, 32], sizes = [2, 32], strides = [1, 1]} : vector<2x128xf32> to vector<2x32xf32>
    %179 = vector.extract_strided_slice %176 {offsets = [0, 64], sizes = [2, 32], strides = [1, 1]} : vector<2x128xf32> to vector<2x32xf32>
    %cst_41 = arith.constant 2.000000e+00 : f32
    %180 = vector.broadcast %cst_41 : f32 to vector<2x32xf32>
    %181 = arith.mulf %180, %179 : vector<2x32xf32>
    %cst_42 = arith.constant 1.000000e+00 : f32
    %182 = vector.broadcast %cst_42 : f32 to vector<2x32xf32>
    %183 = arith.subf %181, %182 : vector<2x32xf32>
    %184 = vector.extract_strided_slice %176 {offsets = [0, 96], sizes = [2, 32], strides = [1, 1]} : vector<2x128xf32> to vector<2x32xf32>
    %185 = arith.mulf %178, %144 : vector<2x32xf32>
    %186 = arith.mulf %177, %183 : vector<2x32xf32>
    %187 = arith.addf %185, %186 : vector<2x32xf32>
    %188 = math.tanh %187 : vector<2x32xf32>
    %189 = arith.mulf %184, %188 : vector<2x32xf32>
    %190 = vector.extract_strided_slice %13 {offsets = [8, 0], sizes = [2, 128], strides = [1, 1]} : vector<16x128xf32> to vector<2x128xf32>
    %cst_43 = arith.constant dense<0.000000e+00> : vector<2x128xf32>
    %191 = tpu.matmul %167, %2, %cst_43 {dimension_numbers = #tpu.dot_dimension_numbers<[1], [0], [0], [1], [0, 0, 1, 1], [], []>} : vector<2x32xf32>, vector<32x128xf32>, vector<2x128xf32> -> vector<2x128xf32>
    %192 = arith.addf %190, %191 : vector<2x128xf32>
    %193 = arith.negf %192 : vector<2x128xf32>
    %194 = math.exp %193 : vector<2x128xf32>
    %cst_44 = arith.constant 1.000000e+00 : f32
    %195 = vector.broadcast %cst_44 : f32 to vector<2x128xf32>
    %196 = arith.addf %195, %194 : vector<2x128xf32>
    %197 = arith.divf %195, %196 : vector<2x128xf32>
    %198 = vector.extract_strided_slice %197 {offsets = [0, 0], sizes = [2, 32], strides = [1, 1]} : vector<2x128xf32> to vector<2x32xf32>
    %199 = vector.extract_strided_slice %197 {offsets = [0, 32], sizes = [2, 32], strides = [1, 1]} : vector<2x128xf32> to vector<2x32xf32>
    %200 = vector.extract_strided_slice %197 {offsets = [0, 64], sizes = [2, 32], strides = [1, 1]} : vector<2x128xf32> to vector<2x32xf32>
    %cst_45 = arith.constant 2.000000e+00 : f32
    %201 = vector.broadcast %cst_45 : f32 to vector<2x32xf32>
    %202 = arith.mulf %201, %200 : vector<2x32xf32>
    %cst_46 = arith.constant 1.000000e+00 : f32
    %203 = vector.broadcast %cst_46 : f32 to vector<2x32xf32>
    %204 = arith.subf %202, %203 : vector<2x32xf32>
    %205 = vector.extract_strided_slice %197 {offsets = [0, 96], sizes = [2, 32], strides = [1, 1]} : vector<2x128xf32> to vector<2x32xf32>
    %206 = arith.mulf %199, %165 : vector<2x32xf32>
    %207 = arith.mulf %198, %204 : vector<2x32xf32>
    %208 = arith.addf %206, %207 : vector<2x32xf32>
    %209 = math.tanh %208 : vector<2x32xf32>
    %210 = arith.mulf %205, %209 : vector<2x32xf32>
    %cst_47 = arith.constant dense<0.000000e+00> : vector<2x128xf32>
    %211 = tpu.matmul %210, %3, %cst_47 {dimension_numbers = #tpu.dot_dimension_numbers<[1], [0], [0], [1], [0, 0, 1, 1], [], []>} : vector<2x32xf32>, vector<32x128xf32>, vector<2x128xf32> -> vector<2x128xf32>
    %cst_48 = arith.constant dense<0.000000e+00> : vector<2x128xf32>
    %212 = tpu.matmul %189, %4, %cst_48 {dimension_numbers = #tpu.dot_dimension_numbers<[1], [0], [0], [1], [0, 0, 1, 1], [], []>} : vector<2x32xf32>, vector<32x128xf32>, vector<2x128xf32> -> vector<2x128xf32>
    %213 = arith.addf %211, %212 : vector<2x128xf32>
    %214 = arith.addf %213, %10 : vector<2x128xf32>
    %215 = arith.negf %214 : vector<2x128xf32>
    %216 = math.exp %215 : vector<2x128xf32>
    %cst_49 = arith.constant 1.000000e+00 : f32
    %217 = vector.broadcast %cst_49 : f32 to vector<2x128xf32>
    %218 = arith.addf %217, %216 : vector<2x128xf32>
    %219 = arith.divf %217, %218 : vector<2x128xf32>
    %220 = vector.extract_strided_slice %219 {offsets = [0, 0], sizes = [2, 32], strides = [1, 1]} : vector<2x128xf32> to vector<2x32xf32>
    %221 = vector.extract_strided_slice %219 {offsets = [0, 32], sizes = [2, 32], strides = [1, 1]} : vector<2x128xf32> to vector<2x32xf32>
    %222 = vector.extract_strided_slice %219 {offsets = [0, 64], sizes = [2, 32], strides = [1, 1]} : vector<2x128xf32> to vector<2x32xf32>
    %cst_50 = arith.constant 2.000000e+00 : f32
    %223 = vector.broadcast %cst_50 : f32 to vector<2x32xf32>
    %224 = arith.mulf %223, %222 : vector<2x32xf32>
    %cst_51 = arith.constant 1.000000e+00 : f32
    %225 = vector.broadcast %cst_51 : f32 to vector<2x32xf32>
    %226 = arith.subf %224, %225 : vector<2x32xf32>
    %227 = vector.extract_strided_slice %219 {offsets = [0, 96], sizes = [2, 32], strides = [1, 1]} : vector<2x128xf32> to vector<2x32xf32>
    %228 = arith.mulf %221, %187 : vector<2x32xf32>
    %229 = arith.mulf %220, %226 : vector<2x32xf32>
    %230 = arith.addf %228, %229 : vector<2x32xf32>
    %231 = math.tanh %230 : vector<2x32xf32>
    %232 = arith.mulf %227, %231 : vector<2x32xf32>
    %233 = vector.extract_strided_slice %13 {offsets = [10, 0], sizes = [2, 128], strides = [1, 1]} : vector<16x128xf32> to vector<2x128xf32>
    %cst_52 = arith.constant dense<0.000000e+00> : vector<2x128xf32>
    %234 = tpu.matmul %210, %2, %cst_52 {dimension_numbers = #tpu.dot_dimension_numbers<[1], [0], [0], [1], [0, 0, 1, 1], [], []>} : vector<2x32xf32>, vector<32x128xf32>, vector<2x128xf32> -> vector<2x128xf32>
    %235 = arith.addf %233, %234 : vector<2x128xf32>
    %236 = arith.negf %235 : vector<2x128xf32>
    %237 = math.exp %236 : vector<2x128xf32>
    %cst_53 = arith.constant 1.000000e+00 : f32
    %238 = vector.broadcast %cst_53 : f32 to vector<2x128xf32>
    %239 = arith.addf %238, %237 : vector<2x128xf32>
    %240 = arith.divf %238, %239 : vector<2x128xf32>
    %241 = vector.extract_strided_slice %240 {offsets = [0, 0], sizes = [2, 32], strides = [1, 1]} : vector<2x128xf32> to vector<2x32xf32>
    %242 = vector.extract_strided_slice %240 {offsets = [0, 32], sizes = [2, 32], strides = [1, 1]} : vector<2x128xf32> to vector<2x32xf32>
    %243 = vector.extract_strided_slice %240 {offsets = [0, 64], sizes = [2, 32], strides = [1, 1]} : vector<2x128xf32> to vector<2x32xf32>
    %cst_54 = arith.constant 2.000000e+00 : f32
    %244 = vector.broadcast %cst_54 : f32 to vector<2x32xf32>
    %245 = arith.mulf %244, %243 : vector<2x32xf32>
    %cst_55 = arith.constant 1.000000e+00 : f32
    %246 = vector.broadcast %cst_55 : f32 to vector<2x32xf32>
    %247 = arith.subf %245, %246 : vector<2x32xf32>
    %248 = vector.extract_strided_slice %240 {offsets = [0, 96], sizes = [2, 32], strides = [1, 1]} : vector<2x128xf32> to vector<2x32xf32>
    %249 = arith.mulf %242, %208 : vector<2x32xf32>
    %250 = arith.mulf %241, %247 : vector<2x32xf32>
    %251 = arith.addf %249, %250 : vector<2x32xf32>
    %252 = math.tanh %251 : vector<2x32xf32>
    %253 = arith.mulf %248, %252 : vector<2x32xf32>
    %cst_56 = arith.constant dense<0.000000e+00> : vector<2x128xf32>
    %254 = tpu.matmul %253, %3, %cst_56 {dimension_numbers = #tpu.dot_dimension_numbers<[1], [0], [0], [1], [0, 0, 1, 1], [], []>} : vector<2x32xf32>, vector<32x128xf32>, vector<2x128xf32> -> vector<2x128xf32>
    %cst_57 = arith.constant dense<0.000000e+00> : vector<2x128xf32>
    %255 = tpu.matmul %232, %4, %cst_57 {dimension_numbers = #tpu.dot_dimension_numbers<[1], [0], [0], [1], [0, 0, 1, 1], [], []>} : vector<2x32xf32>, vector<32x128xf32>, vector<2x128xf32> -> vector<2x128xf32>
    %256 = arith.addf %254, %255 : vector<2x128xf32>
    %257 = arith.addf %256, %10 : vector<2x128xf32>
    %258 = arith.negf %257 : vector<2x128xf32>
    %259 = math.exp %258 : vector<2x128xf32>
    %cst_58 = arith.constant 1.000000e+00 : f32
    %260 = vector.broadcast %cst_58 : f32 to vector<2x128xf32>
    %261 = arith.addf %260, %259 : vector<2x128xf32>
    %262 = arith.divf %260, %261 : vector<2x128xf32>
    %263 = vector.extract_strided_slice %262 {offsets = [0, 0], sizes = [2, 32], strides = [1, 1]} : vector<2x128xf32> to vector<2x32xf32>
    %264 = vector.extract_strided_slice %262 {offsets = [0, 32], sizes = [2, 32], strides = [1, 1]} : vector<2x128xf32> to vector<2x32xf32>
    %265 = vector.extract_strided_slice %262 {offsets = [0, 64], sizes = [2, 32], strides = [1, 1]} : vector<2x128xf32> to vector<2x32xf32>
    %cst_59 = arith.constant 2.000000e+00 : f32
    %266 = vector.broadcast %cst_59 : f32 to vector<2x32xf32>
    %267 = arith.mulf %266, %265 : vector<2x32xf32>
    %cst_60 = arith.constant 1.000000e+00 : f32
    %268 = vector.broadcast %cst_60 : f32 to vector<2x32xf32>
    %269 = arith.subf %267, %268 : vector<2x32xf32>
    %270 = vector.extract_strided_slice %262 {offsets = [0, 96], sizes = [2, 32], strides = [1, 1]} : vector<2x128xf32> to vector<2x32xf32>
    %271 = arith.mulf %264, %230 : vector<2x32xf32>
    %272 = arith.mulf %263, %269 : vector<2x32xf32>
    %273 = arith.addf %271, %272 : vector<2x32xf32>
    %274 = math.tanh %273 : vector<2x32xf32>
    %275 = arith.mulf %270, %274 : vector<2x32xf32>
    %276 = vector.extract_strided_slice %13 {offsets = [12, 0], sizes = [2, 128], strides = [1, 1]} : vector<16x128xf32> to vector<2x128xf32>
    %cst_61 = arith.constant dense<0.000000e+00> : vector<2x128xf32>
    %277 = tpu.matmul %253, %2, %cst_61 {dimension_numbers = #tpu.dot_dimension_numbers<[1], [0], [0], [1], [0, 0, 1, 1], [], []>} : vector<2x32xf32>, vector<32x128xf32>, vector<2x128xf32> -> vector<2x128xf32>
    %278 = arith.addf %276, %277 : vector<2x128xf32>
    %279 = arith.negf %278 : vector<2x128xf32>
    %280 = math.exp %279 : vector<2x128xf32>
    %cst_62 = arith.constant 1.000000e+00 : f32
    %281 = vector.broadcast %cst_62 : f32 to vector<2x128xf32>
    %282 = arith.addf %281, %280 : vector<2x128xf32>
    %283 = arith.divf %281, %282 : vector<2x128xf32>
    %284 = vector.extract_strided_slice %283 {offsets = [0, 0], sizes = [2, 32], strides = [1, 1]} : vector<2x128xf32> to vector<2x32xf32>
    %285 = vector.extract_strided_slice %283 {offsets = [0, 32], sizes = [2, 32], strides = [1, 1]} : vector<2x128xf32> to vector<2x32xf32>
    %286 = vector.extract_strided_slice %283 {offsets = [0, 64], sizes = [2, 32], strides = [1, 1]} : vector<2x128xf32> to vector<2x32xf32>
    %cst_63 = arith.constant 2.000000e+00 : f32
    %287 = vector.broadcast %cst_63 : f32 to vector<2x32xf32>
    %288 = arith.mulf %287, %286 : vector<2x32xf32>
    %cst_64 = arith.constant 1.000000e+00 : f32
    %289 = vector.broadcast %cst_64 : f32 to vector<2x32xf32>
    %290 = arith.subf %288, %289 : vector<2x32xf32>
    %291 = vector.extract_strided_slice %283 {offsets = [0, 96], sizes = [2, 32], strides = [1, 1]} : vector<2x128xf32> to vector<2x32xf32>
    %292 = arith.mulf %285, %251 : vector<2x32xf32>
    %293 = arith.mulf %284, %290 : vector<2x32xf32>
    %294 = arith.addf %292, %293 : vector<2x32xf32>
    %295 = math.tanh %294 : vector<2x32xf32>
    %296 = arith.mulf %291, %295 : vector<2x32xf32>
    %cst_65 = arith.constant dense<0.000000e+00> : vector<2x128xf32>
    %297 = tpu.matmul %296, %3, %cst_65 {dimension_numbers = #tpu.dot_dimension_numbers<[1], [0], [0], [1], [0, 0, 1, 1], [], []>} : vector<2x32xf32>, vector<32x128xf32>, vector<2x128xf32> -> vector<2x128xf32>
    %cst_66 = arith.constant dense<0.000000e+00> : vector<2x128xf32>
    %298 = tpu.matmul %275, %4, %cst_66 {dimension_numbers = #tpu.dot_dimension_numbers<[1], [0], [0], [1], [0, 0, 1, 1], [], []>} : vector<2x32xf32>, vector<32x128xf32>, vector<2x128xf32> -> vector<2x128xf32>
    %299 = arith.addf %297, %298 : vector<2x128xf32>
    %300 = arith.addf %299, %10 : vector<2x128xf32>
    %301 = arith.negf %300 : vector<2x128xf32>
    %302 = math.exp %301 : vector<2x128xf32>
    %cst_67 = arith.constant 1.000000e+00 : f32
    %303 = vector.broadcast %cst_67 : f32 to vector<2x128xf32>
    %304 = arith.addf %303, %302 : vector<2x128xf32>
    %305 = arith.divf %303, %304 : vector<2x128xf32>
    %306 = vector.extract_strided_slice %305 {offsets = [0, 0], sizes = [2, 32], strides = [1, 1]} : vector<2x128xf32> to vector<2x32xf32>
    %307 = vector.extract_strided_slice %305 {offsets = [0, 32], sizes = [2, 32], strides = [1, 1]} : vector<2x128xf32> to vector<2x32xf32>
    %308 = vector.extract_strided_slice %305 {offsets = [0, 64], sizes = [2, 32], strides = [1, 1]} : vector<2x128xf32> to vector<2x32xf32>
    %cst_68 = arith.constant 2.000000e+00 : f32
    %309 = vector.broadcast %cst_68 : f32 to vector<2x32xf32>
    %310 = arith.mulf %309, %308 : vector<2x32xf32>
    %cst_69 = arith.constant 1.000000e+00 : f32
    %311 = vector.broadcast %cst_69 : f32 to vector<2x32xf32>
    %312 = arith.subf %310, %311 : vector<2x32xf32>
    %313 = vector.extract_strided_slice %305 {offsets = [0, 96], sizes = [2, 32], strides = [1, 1]} : vector<2x128xf32> to vector<2x32xf32>
    %314 = arith.mulf %307, %273 : vector<2x32xf32>
    %315 = arith.mulf %306, %312 : vector<2x32xf32>
    %316 = arith.addf %314, %315 : vector<2x32xf32>
    %317 = math.tanh %316 : vector<2x32xf32>
    %318 = arith.mulf %313, %317 : vector<2x32xf32>
    %319 = vector.extract_strided_slice %13 {offsets = [14, 0], sizes = [2, 128], strides = [1, 1]} : vector<16x128xf32> to vector<2x128xf32>
    %cst_70 = arith.constant dense<0.000000e+00> : vector<2x128xf32>
    %320 = tpu.matmul %296, %2, %cst_70 {dimension_numbers = #tpu.dot_dimension_numbers<[1], [0], [0], [1], [0, 0, 1, 1], [], []>} : vector<2x32xf32>, vector<32x128xf32>, vector<2x128xf32> -> vector<2x128xf32>
    %321 = arith.addf %319, %320 : vector<2x128xf32>
    %322 = arith.negf %321 : vector<2x128xf32>
    %323 = math.exp %322 : vector<2x128xf32>
    %cst_71 = arith.constant 1.000000e+00 : f32
    %324 = vector.broadcast %cst_71 : f32 to vector<2x128xf32>
    %325 = arith.addf %324, %323 : vector<2x128xf32>
    %326 = arith.divf %324, %325 : vector<2x128xf32>
    %327 = vector.extract_strided_slice %326 {offsets = [0, 0], sizes = [2, 32], strides = [1, 1]} : vector<2x128xf32> to vector<2x32xf32>
    %328 = vector.extract_strided_slice %326 {offsets = [0, 32], sizes = [2, 32], strides = [1, 1]} : vector<2x128xf32> to vector<2x32xf32>
    %329 = vector.extract_strided_slice %326 {offsets = [0, 64], sizes = [2, 32], strides = [1, 1]} : vector<2x128xf32> to vector<2x32xf32>
    %cst_72 = arith.constant 2.000000e+00 : f32
    %330 = vector.broadcast %cst_72 : f32 to vector<2x32xf32>
    %331 = arith.mulf %330, %329 : vector<2x32xf32>
    %cst_73 = arith.constant 1.000000e+00 : f32
    %332 = vector.broadcast %cst_73 : f32 to vector<2x32xf32>
    %333 = arith.subf %331, %332 : vector<2x32xf32>
    %334 = vector.extract_strided_slice %326 {offsets = [0, 96], sizes = [2, 32], strides = [1, 1]} : vector<2x128xf32> to vector<2x32xf32>
    %335 = arith.mulf %328, %294 : vector<2x32xf32>
    %336 = arith.mulf %327, %333 : vector<2x32xf32>
    %337 = arith.addf %335, %336 : vector<2x32xf32>
    %338 = math.tanh %337 : vector<2x32xf32>
    %339 = arith.mulf %334, %338 : vector<2x32xf32>
    %cst_74 = arith.constant dense<0.000000e+00> : vector<2x128xf32>
    %340 = tpu.matmul %339, %3, %cst_74 {dimension_numbers = #tpu.dot_dimension_numbers<[1], [0], [0], [1], [0, 0, 1, 1], [], []>} : vector<2x32xf32>, vector<32x128xf32>, vector<2x128xf32> -> vector<2x128xf32>
    %cst_75 = arith.constant dense<0.000000e+00> : vector<2x128xf32>
    %341 = tpu.matmul %318, %4, %cst_75 {dimension_numbers = #tpu.dot_dimension_numbers<[1], [0], [0], [1], [0, 0, 1, 1], [], []>} : vector<2x32xf32>, vector<32x128xf32>, vector<2x128xf32> -> vector<2x128xf32>
    %342 = arith.addf %340, %341 : vector<2x128xf32>
    %343 = arith.addf %342, %10 : vector<2x128xf32>
    %344 = arith.negf %343 : vector<2x128xf32>
    %345 = math.exp %344 : vector<2x128xf32>
    %cst_76 = arith.constant 1.000000e+00 : f32
    %346 = vector.broadcast %cst_76 : f32 to vector<2x128xf32>
    %347 = arith.addf %346, %345 : vector<2x128xf32>
    %348 = arith.divf %346, %347 : vector<2x128xf32>
    %349 = vector.extract_strided_slice %348 {offsets = [0, 0], sizes = [2, 32], strides = [1, 1]} : vector<2x128xf32> to vector<2x32xf32>
    %350 = vector.extract_strided_slice %348 {offsets = [0, 32], sizes = [2, 32], strides = [1, 1]} : vector<2x128xf32> to vector<2x32xf32>
    %351 = vector.extract_strided_slice %348 {offsets = [0, 64], sizes = [2, 32], strides = [1, 1]} : vector<2x128xf32> to vector<2x32xf32>
    %cst_77 = arith.constant 2.000000e+00 : f32
    %352 = vector.broadcast %cst_77 : f32 to vector<2x32xf32>
    %353 = arith.mulf %352, %351 : vector<2x32xf32>
    %cst_78 = arith.constant 1.000000e+00 : f32
    %354 = vector.broadcast %cst_78 : f32 to vector<2x32xf32>
    %355 = arith.subf %353, %354 : vector<2x32xf32>
    %356 = vector.extract_strided_slice %348 {offsets = [0, 96], sizes = [2, 32], strides = [1, 1]} : vector<2x128xf32> to vector<2x32xf32>
    %357 = arith.mulf %350, %316 : vector<2x32xf32>
    %358 = arith.mulf %349, %355 : vector<2x32xf32>
    %359 = arith.addf %357, %358 : vector<2x32xf32>
    %360 = math.tanh %359 : vector<2x32xf32>
    %361 = arith.mulf %356, %360 : vector<2x32xf32>
    %c0_79 = arith.constant 0 : index
    %c0_80 = arith.constant 0 : index
    %362 = vector.load %arg3[%c0_79, %c0_80] : memref<33x256xf32, #tpu.memory_space<vmem>>, vector<33x256xf32>
    %363 = vector.extract_strided_slice %362 {offsets = [0, 0], sizes = [32, 256], strides = [1, 1]} : vector<33x256xf32> to vector<32x256xf32>
    %364 = vector.extract_strided_slice %362 {offsets = [32, 0], sizes = [1, 256], strides = [1, 1]} : vector<33x256xf32> to vector<1x256xf32>
    %365 = vector.shape_cast %364 : vector<1x256xf32> to vector<1x256xf32>
    %366 = vector.broadcast %365 : vector<1x256xf32> to vector<2x256xf32>
    %c0_81 = arith.constant 0 : index
    %c0_82 = arith.constant 0 : index
    %367 = vector.load %arg4[%c0_81, %c0_82] : memref<257x128xf32, #tpu.memory_space<vmem>>, vector<257x128xf32>
    %368 = vector.extract_strided_slice %367 {offsets = [0, 0], sizes = [256, 128], strides = [1, 1]} : vector<257x128xf32> to vector<256x128xf32>
    %369 = vector.extract_strided_slice %367 {offsets = [256, 0], sizes = [1, 128], strides = [1, 1]} : vector<257x128xf32> to vector<1x128xf32>
    %370 = vector.shape_cast %369 : vector<1x128xf32> to vector<1x128xf32>
    %371 = vector.broadcast %370 : vector<1x128xf32> to vector<2x128xf32>
    %cst_83 = arith.constant dense<0.000000e+00> : vector<2x256xf32>
    %372 = tpu.matmul %361, %363, %cst_83 {dimension_numbers = #tpu.dot_dimension_numbers<[1], [0], [0], [1], [0, 0, 1, 1], [], []>} : vector<2x32xf32>, vector<32x256xf32>, vector<2x256xf32> -> vector<2x256xf32>
    %373 = arith.addf %372, %366 : vector<2x256xf32>
    %cst_84 = arith.constant 0.000000e+00 : f32
    %374 = vector.broadcast %cst_84 : f32 to vector<2x256xf32>
    %375 = arith.maximumf %373, %374 : vector<2x256xf32>
    %cst_85 = arith.constant dense<0.000000e+00> : vector<2x128xf32>
    %376 = tpu.matmul %375, %368, %cst_85 {dimension_numbers = #tpu.dot_dimension_numbers<[1], [0], [0], [1], [0, 0, 1, 1], [], []>} : vector<2x256xf32>, vector<256x128xf32>, vector<2x128xf32> -> vector<2x128xf32>
    %377 = arith.addf %376, %371 : vector<2x128xf32>
    %c0_86 = arith.constant 0 : index
    %c0_87 = arith.constant 0 : index
    %378 = vector.load %arg5[%c0_86, %c0_87] : memref<2x128xf32, #tpu.memory_space<vmem>>, vector<2x128xf32>
    tpu.vector_store %arg5[%c0_86, %c0_87], %377 {strides = array<i32>} : memref<2x128xf32, #tpu.memory_space<vmem>>, vector<2x128xf32>,
    return
  }
  func.func @transform_0(%arg0: i32) -> (i32, i32) {
    %c0_i32 = arith.constant 0 : i32
    %c0_i32_0 = arith.constant 0 : i32
    %c0_i32_1 = arith.constant 0 : i32
    return %c0_i32, %c0_i32_0 : i32, i32
  }
  func.func @transform_1(%arg0: i32) -> (i32, i32) {
    %c0_i32 = arith.constant 0 : i32
    %c0_i32_0 = arith.constant 0 : i32
    %c0_i32_1 = arith.constant 0 : i32
    return %c0_i32, %c0_i32_0 : i32, i32
  }
  func.func @transform_2(%arg0: i32) -> (i32, i32) {
    %c0_i32 = arith.constant 0 : i32
    %c0_i32_0 = arith.constant 0 : i32
    %c0_i32_1 = arith.constant 0 : i32
    return %c0_i32, %c0_i32_0 : i32, i32
  }
  func.func @transform_3(%arg0: i32) -> (i32, i32) {
    %c0_i32 = arith.constant 0 : i32
    %c0_i32_0 = arith.constant 0 : i32
    %c0_i32_1 = arith.constant 0 : i32
    return %c0_i32, %c0_i32_0 : i32, i32
  }
  func.func @transform_4(%arg0: i32) -> (i32, i32) {
    %c0_i32 = arith.constant 0 : i32
    %c0_i32_0 = arith.constant 0 : i32
    %c0_i32_1 = arith.constant 0 : i32
    return %c0_i32, %c0_i32_0 : i32, i32
  }
}

</mosaic_0001>

<bundles_post_ra>
// kernel: forward.1
= control target key start
LH: loop header
LB: loop body
LE: loop exit
PB: predicated region body
PF: predicated region fallthrough
CT: control target
= control target key end

     0   :  { %9 = vsyncpa [#allocation3], 0  ;;  %s2074_s0 = inlined_call_operand.vmem [shape: f32[16,16], index: 0, kind: input, shape index: {}]   ;;  %s2075_s1 = inlined_call_operand.hbm [shape: f32[114,128], index: 1, kind: input, shape index: {}]   ;;  %s2076_s2 = inlined_call_operand.hbm [shape: f32[33,256], index: 2, kind: input, shape index: {}]   ;;  %s2077_s3 = inlined_call_operand.hbm [shape: f32[257,128], index: 3, kind: input, shape index: {}]   ;;  %s2078_s4 = inlined_call_operand.vmem [shape: f32[2,128], index: 4, kind: output, shape index: {}]  }
   0x1   :  { %10 = vsyncpa [#allocation5], 0  ;;  %s30_s17 = sshll.u32 %s2076_s2, 4  ;;  %s1724_s18 = smov [#allocation4]   ;;  %s31_s17 = int_to_ptr.hbm [resolvable:$true] %s30_s17 }
   0x2   :  { %s32_s19 = sshll.u32 %s1724_s18, 4  ;;  %s17_s22 = sshll.u32 %s2075_s1, 4  ;;  %s33_s19 = int_to_ptr.vmem [resolvable:$true] %s32_s19  ;;  %s18_s22 = int_to_ptr.hbm [resolvable:$true] %s17_s22 }
   0x3   :  { %s1725_s23 = smov 256   ;;  %s1726_s24 = smov 16  }
   0x4   :  { %38 = dma.hbm_to_vmem [thread:$0]  %s31_s17, 1280, %s33_s19, [#allocation5], %s1725_s23, %s1725_s23, %s1726_s24  }
   0x5   :  { %s1727_s25 = smov [#allocation2]   ;;  %s1728_s27 = smov 128  }
   0x6   :  { %s19_s26 = sshll.u32 %s1727_s25, 4  ;;  %s1729_s28 = smov 8   ;;  %s20_s26 = int_to_ptr.vmem [resolvable:$true] %s19_s26 }
   0x7   :  { %25 = dma.hbm_to_vmem [thread:$0]  %s18_s22, 1920, %s20_s26, [#allocation3], %s1728_s27, %s1728_s27, %s1729_s28  }
   0x8   :  { %s43_s30 = sshll.u32 %s2077_s3, 4  ;;  %s1730_s5 = smov [#allocation6]   ;;  %s44_s30 = int_to_ptr.hbm [resolvable:$true] %s43_s30 }
   0x9   :  { %s45_s6 = sshll.u32 %s1730_s5, 4  ;;  %s46_s6 = int_to_ptr.vmem [resolvable:$true] %s45_s6 }
   0xa   :  { %51 = dma.hbm_to_vmem [thread:$0]  %s44_s30, 4224, %s46_s6, [#allocation5], %s1728_s27, %s1728_s27, %s1729_s28  }
   0xb   :  { %1720 = dma.done.wait [#allocation3], 1920  }
   0xc   :  { %1721 = vsyncadd [#allocation3], 4294965376 }
   0xd   :  { %1722 = dma.done.wait [#allocation5], 5504  }
   0xe   :  { %1723 = vsyncadd [#allocation5], 4294961792  ;;  %v1768_v0 = vld [vmem:[#allocation2 + $0x28] sm:$0xff]  ;;  %v1770_v2 = vld [vmem:[#allocation2 + $0x20] sm:$0xff]  ;;  %vm83_vm0 = vcmask 130048   ;;  %v1731_v7 = vmov 0.0  }
   0xf   :  { %v65_v1 = vld [vmem:[#allocation2 + $0x8] sm:$0xff]  ;;  %129 = vmatpush.msra.mxu2 %v1768_v0  ;;  %v64_v3 = vld [vmem:[#allocation2] sm:$0xff]  ;;  %v1776_v5 = vld [vmem:[#allocation2 + $0x18] sm:$0xff]  ;;  %427 = vmatpush.msra.mxu0 %v1768_v0  ;;  %s1732_s7 = smov 64   ;;  %s1733_s8 = smov 32   ;;  %vm113_vm5 = vcmask 261120  }
  0x10   :  { %104 = vmatpush.msra.mxu3 %v65_v1  ;;  %v81_v4 = vld [vmem:[%s2074_s0] sm:$0xff]  ;;  %v1781_v6 = vld [vmem:[#allocation2 + $0x10] sm:$0xff]  ;;  %v1803_v35 = vld [vmem:[#allocation2 + $0x68] sm:$0xff] }
  0x11   :  { %130 = vmatpush.msra.mxu2 %v1770_v2  ;;  %428 = vmatpush.msra.mxu0 %v1770_v2  ;;  %v1789_v8 = vld [vmem:[#allocation2 + $0x70] sm:$0x3]  ;;  %v1805_v36 = vld [vmem:[#allocation2 + $0x60] sm:$0xff]  ;;  %v82_v37 = vld [vmem:[%s2074_s0 + $0x8] sm:$0xff] }
  0x12   :  { %105 = vmatpush.msra.mxu3 %v64_v3  ;;  %v79_v9 = vperm.slane %v1789_v8, 0  ;;  %v1811_v38 = vld [vmem:[#allocation2 + $0x48] sm:$0xff]  ;;  %497 = vmatpush.msra.mxu1 %v1803_v35  ;;  %v1814_v39 = vld [vmem:[#allocation2 + $0x58] sm:$0xff]  ;;  %v1817_v40 = vld [vmem:[#allocation2 + $0x40] sm:$0xff]  ;;  %v1870_v49 = vperm.slane %v1789_v8, 1 }
  0x13   :  { %1481 = vmatmul.msk.f32.vlgmr.msra.gmra.mxu3 %vm83_vm0, %v81_v4  ;;  %131 = vmatpush.msra.mxu2 %v1776_v5  ;;  %v1822_v41 = vld [vmem:[#allocation2 + $0x50] sm:$0xff]  ;;  %v1824_v42 = vld [vmem:[#allocation2 + $0x38] sm:$0xff] }
  0x14   :  { %429 = vmatpush.msra.mxu0 %v1776_v5  ;;  %213 = vmatpush.msrb.mxu3 %v1811_v38  ;;  %v1830_v43 = vld [vmem:[#allocation2 + $0x30] sm:$0xff] }
  0x15   :  { %132 = vmatpush.msra.mxu2 %v1781_v6  ;;  %498 = vmatpush.msra.mxu1 %v1805_v36 }
  0x16   :  { %133 = vmatmul.f32.vlgmr.msra.gmra.mxu2 %v1731_v7  ;;  %430 = vmatpush.msra.mxu0 %v1781_v6 }
  0x17   :  { %188 = vmatpush.msrb.mxu2 %v1803_v35  ;;  %214 = vmatpush.msrb.mxu3 %v1817_v40 }
  0x18   :  { %652 = vmatpush.msrb.mxu0 %v1803_v35  ;;  %499 = vmatpush.msra.mxu1 %v1814_v39 }
  0x19   :  { %189 = vmatpush.msrb.mxu2 %v1805_v36  ;;  %215 = vmatpush.msrb.mxu3 %v1824_v42 }
  0x1a   :  { %653 = vmatpush.msrb.mxu0 %v1805_v36  ;;  %500 = vmatpush.msra.mxu1 %v1822_v41 }
  0x1b   :  { %1482 = vmatmul.msk.f32.gmra.mxu3 %vm83_vm0, %v82_v37  ;;  %190 = vmatpush.msrb.mxu2 %v1814_v39 }
  0x1c   :  { %654 = vmatpush.msrb.mxu0 %v1814_v39  ;;  %216 = vmatpush.msrb.mxu3 %v1830_v43 }
  0x1d   :  { %191 = vmatpush.msrb.mxu2 %v1822_v41  ;;  %678 = vmatpush.msrb.mxu1 %v1811_v38 }
  0x1e   :  { %192 = vmatmul.f32.vlgmr.msrb.gmra.mxu2 %v1731_v7  ;;  %368 = vmatpush.msra.mxu3 %v1811_v38 }
  0x1f   :  { %272 = vmatpush.msra.mxu2 %v1768_v0  ;;  %655 = vmatpush.msrb.mxu0 %v1822_v41 }
  0x20   :  { %369 = vmatpush.msra.mxu3 %v1817_v40  ;;  %679 = vmatpush.msrb.mxu1 %v1817_v40 }
  0x21   :  { %273 = vmatpush.msra.mxu2 %v1770_v2 }
  0x22   :  { %370 = vmatpush.msra.mxu3 %v1824_v42  ;;  %680 = vmatpush.msrb.mxu1 %v1824_v42 }
  0x23   :  { %274 = vmatpush.msra.mxu2 %v1776_v5 }
  0x24   :  { %371 = vmatpush.msra.mxu3 %v1830_v43  ;;  %681 = vmatpush.msrb.mxu1 %v1830_v43 }
  0x25   :  { %275 = vmatpush.msra.mxu2 %v1781_v6 }
  0x27   :  { %342 = vmatpush.msrb.mxu2 %v1803_v35 }
  0x29   :  { %343 = vmatpush.msrb.mxu2 %v1805_v36 }
  0x2b   :  { %344 = vmatpush.msrb.mxu2 %v1814_v39 }
  0x2d   :  { %345 = vmatpush.msrb.mxu2 %v1822_v41 }
  0x96   :  { %v107_v10 = vpop.f32.mrf.mxu3 }
  0x97   :  { %v1794_v11 = vadd.f32 %v107_v10, %v79_v9 }
  0x99   :  { %v134_v12 = vpop.f32.mrf.mxu2 }
  0x9a   :  { %v137_v13 = vadd.f32 %v134_v12, %v1794_v11 }
  0x9c   :  { %v1483_v14 = vmul.f32 -1.442695, %v137_v13 }
  0x9e   :  { %1552 = vpow2.f32 %v1483_v14  ;;  %v1867_v47 = vpop.f32.mrf.mxu3 }
  0xa1   :  { %v193_v48 = vpop.f32.mrf.mxu2 }
  0xa4   :  { %v1553_v15 = vpop.eup %1552 }
  0xa5   :  { %v141_v16 = vadd.f32 1.0, %v1553_v15 }
  0xa7   :  { %1554 = vrcp.f32 %v141_v16  ;;  %v153_v20 = vand.u32 2147483648, %v141_v16  ;;  %v151_v22 = vand.u32 2147483647, %v141_v16  ;;  %vm147_vm2 = vweird.f32 %v141_v16 }
  0xa9   :  { %v154_v24 = vor.u32 1.1754944e-38, %v153_v20  ;;  %vm152_vm4 = vcmp.eq.f32.partialorder %v151_v22, 8.507059e+37 }
  0xad   :  { %v1555_v17 = vpop.eup %1554 }
  0xae   :  { %v143_v18 = vmul.f32 %v1555_v17, %v141_v16  ;;  %vm148_vm1 = vweird.f32 %v1555_v17 }
  0xaf   :  { %vm149_vm3 = vmor %vm147_vm2, %vm148_vm1 }
  0xb0   :  { %v144_v19 = vsub.f32 1.0, %v143_v18 }
  0xb2   :  { %v145_v21 = vmul.f32 %v1555_v17, %v144_v19 }
  0xb4   :  { %v146_v23 = vadd.f32 %v1555_v17, %v145_v21 }
  0xb6   :  { %v150_v25 = vsel %vm149_vm3, %v1555_v17, %v146_v23 }
  0xb7   :  { %v155_v26 = vsel %vm152_vm4, %v154_v24, %v150_v25 }
  0xb8   :  { %v157_v27 = vmul.f32 2.0, %v155_v26  ;;  %v159_v31 = vmul.f32 0.0, %v155_v26 }
  0xba   :  { %v1484_v28 = vadd.f32 -1.0, %v157_v27 }
  0xbc   :  { %161 = vrot.lane.b32.xlu0 %v1484_v28, %s1732_s7 }
 0x12e   :  { %v162_v29 = vpop.permute.xlu0 %161 }
 0x12f   :  { %v164_v30 = vmul.f32 %v162_v29, %v155_v26 }
 0x131   :  { %166 = vrot.lane.b32.xlu0 %v164_v30, %s1733_s8 }
 0x1a3   :  { %v167_v32 = vpop.permute.xlu0 %166 }
 0x1a4   :  { %v1799_v33 = vadd.f32 %v167_v32, %v159_v31 }
 0x1a6   :  { %1556 = vtanh.f32 %v1799_v33 }
 0x1ac   :  { %v1557_v34 = vpop.eup %1556 }
 0x1ad   :  { %172 = vrot.lane.b32.xlu1 %v1557_v34, %s1732_s7  ;;  %v306_v34 = vrot.slane %v1799_v33, 6 }
 0x21f   :  { %v173_v44 = vpop.permute.xlu1 %172 }
 0x220   :  { %v175_v45 = vmul.f32 %v173_v44, %v155_v26 }
 0x222   :  { %197 = vrot.lane.b32.xlu1 %v175_v45, %s1733_s8 }
 0x294   :  { %v198_v46 = vpop.permute.xlu1 %197 }
 0x295   :  { %1485 = vmatmul.msk.f32.vlgmr.msrb.gmra.mxu3 %vm113_vm5, %v198_v46  ;;  %1488 = vmatmul.msk.f32.vlgmr.msra.gmra.mxu2 %vm113_vm5, %v198_v46 }
 0x296   :  { %523 = vmatpush.msra.mxu2 %v1811_v38  ;;  %582 = vmatpush.msrb.mxu3 %v1768_v0 }
 0x298   :  { %524 = vmatpush.msra.mxu2 %v1817_v40  ;;  %583 = vmatpush.msrb.mxu3 %v1770_v2 }
 0x29a   :  { %525 = vmatpush.msra.mxu2 %v1824_v42  ;;  %584 = vmatpush.msrb.mxu3 %v1776_v5 }
 0x29c   :  { %526 = vmatpush.msra.mxu2 %v1830_v43  ;;  %585 = vmatpush.msrb.mxu3 %v1781_v6 }
 0x318   :  { %v218_v50 = vpop.f32.mrf.mxu3  ;;  %v277_v51 = vpop.f32.mrf.mxu2 }
 0x319   :  { %v219_v52 = vadd.f32 %v218_v50, %v193_v48  ;;  %v281_v53 = vrot.slane %v277_v51, 6 }
 0x31b   :  { %v221_v54 = vadd.f32 %v219_v52, %v1870_v49  ;;  %v283_v55 = vadd.f32 %v281_v53, %v1794_v11 }
 0x31d   :  { %v1486_v56 = vmul.f32 -1.442695, %v221_v54  ;;  %v1489_v57 = vmul.f32 -1.442695, %v283_v55 }
 0x31f   :  { %1558 = vpow2.f32 %v1486_v56 }
 0x320   :  { %1560 = vpow2.f32 %v1489_v57 }
 0x325   :  { %v1559_v58 = vpop.eup %1558 }
 0x326   :  { %v1561_v59 = vpop.eup %1560  ;;  %v225_v60 = vadd.f32 1.0, %v1559_v58 }
 0x327   :  { %v287_v61 = vadd.f32 1.0, %v1561_v59 }
 0x328   :  { %1562 = vrcp.f32 %v225_v60  ;;  %v237_v18 = vand.u32 2147483648, %v225_v60  ;;  %vm231_vm11 = vweird.f32 %v225_v60  ;;  %v235_v20 = vand.u32 2147483647, %v225_v60 }
 0x329   :  { %1564 = vrcp.f32 %v287_v61  ;;  %v299_v10 = vand.u32 2147483648, %v287_v61  ;;  %v297_v14 = vand.u32 2147483647, %v287_v61  ;;  %vm293_vm7 = vweird.f32 %v287_v61 }
 0x32a   :  { %v238_v24 = vor.u32 1.1754944e-38, %v237_v18  ;;  %vm236_vm13 = vcmp.eq.f32.partialorder %v235_v20, 8.507059e+37 }
 0x32b   :  { %v300_v17 = vor.u32 1.1754944e-38, %v299_v10  ;;  %vm298_vm10 = vcmp.eq.f32.partialorder %v297_v14, 8.507059e+37 }
 0x32e   :  { %v1563_v62 = vpop.eup %1562 }
 0x32f   :  { %v1565_v63 = vpop.eup %1564  ;;  %v227_v1 = vmul.f32 %v1563_v62, %v225_v60  ;;  %vm232_vm8 = vweird.f32 %v1563_v62 }
 0x330   :  { %v289_v3 = vmul.f32 %v1565_v63, %v287_v61  ;;  %vm294_vm6 = vweird.f32 %v1565_v63  ;;  %vm233_vm12 = vmor %vm231_vm11, %vm232_vm8 }
 0x331   :  { %v228_v4 = vsub.f32 1.0, %v227_v1  ;;  %vm295_vm9 = vmor %vm293_vm7, %vm294_vm6 }
 0x332   :  { %v290_v7 = vsub.f32 1.0, %v289_v3 }
 0x333   :  { %v229_v12 = vmul.f32 %v1563_v62, %v228_v4 }
 0x334   :  { %v291_v13 = vmul.f32 %v1565_v63, %v290_v7 }
 0x335   :  { %v230_v16 = vadd.f32 %v1563_v62, %v229_v12 }
 0x336   :  { %v292_v15 = vadd.f32 %v1565_v63, %v291_v13 }
 0x337   :  { %v234_v23 = vsel %vm233_vm12, %v1563_v62, %v230_v16 }
 0x338   :  { %v296_v19 = vsel %vm295_vm9, %v1565_v63, %v292_v15  ;;  %v239_v26 = vsel %vm236_vm13, %v238_v24, %v234_v23 }
 0x339   :  { %v301_v21 = vsel %vm298_vm10, %v300_v17, %v296_v19  ;;  %v241_v27 = vmul.f32 2.0, %v239_v26  ;;  %v243_v46 = vmul.f32 0.0, %v239_v26 }
 0x33a   :  { %v303_v22 = vmul.f32 2.0, %v301_v21  ;;  %v308_v37 = vmul.f32 %v306_v34, %v301_v21 }
 0x33b   :  { %v1487_v28 = vadd.f32 -1.0, %v241_v27 }
 0x33c   :  { %v1490_v25 = vadd.f32 -1.0, %v303_v22 }
 0x33e   :  { %310 = vrot.lane.b32.xlu2 %v1490_v25, %s1732_s7 }
 0x346   :  { %245 = vrot.lane.b32.xlu2 %v1487_v28, %s1732_s7 }
 0x398   :  { %v311_v29 = vpop.permute.xlu2 %310 }
 0x399   :  { %v313_v30 = vmul.f32 %v311_v29, %v301_v21 }
 0x39b   :  { %315 = vrot.lane.b32.xlu0 %v313_v30, %s1733_s8 }
 0x3a0   :  { %v246_v31 = vpop.permute.xlu2 %245 }
 0x3a1   :  { %v248_v32 = vmul.f32 %v246_v31, %v239_v26 }
 0x3a3   :  { %250 = vrot.lane.b32.xlu1 %v248_v32, %s1733_s8 }
 0x40d   :  { %v316_v44 = vpop.permute.xlu0 %315 }
 0x40e   :  { %v1879_v45 = vadd.f32 %v316_v44, %v308_v37 }
 0x410   :  { %1566 = vtanh.f32 %v1879_v45 }
 0x415   :  { %v251_v48 = vpop.permute.xlu1 %250 }
 0x416   :  { %v1567_v50 = vpop.eup %1566  ;;  %v1882_v51 = vadd.f32 %v251_v48, %v243_v46 }
 0x417   :  { %321 = vrot.lane.b32.xlu2 %v1567_v50, %s1732_s7 }
 0x418   :  { %1568 = vtanh.f32 %v1882_v51 }
 0x41e   :  { %v1569_v52 = vpop.eup %1568 }
 0x41f   :  { %256 = vrot.lane.b32.xlu0 %v1569_v52, %s1732_s7 }
 0x471   :  { %v322_v53 = vpop.permute.xlu2 %321 }
 0x472   :  { %v324_v33 = vmul.f32 %v322_v53, %v301_v21 }
 0x474   :  { %v351_v54 = vrot.slane %v324_v33, 2 }
 0x476   :  { %352 = vrot.lane.b32.xlu1 %v351_v54, %s1733_s8 }
 0x491   :  { %v257_v55 = vpop.permute.xlu0 %256 }
 0x492   :  { %v259_v56 = vmul.f32 %v257_v55, %v239_v26  ;;  %v461_v55 = vrot.slane %v1879_v45, 6 }
 0x494   :  { %326 = vrot.lane.b32.xlu2 %v259_v56, %s1733_s8 }
 0x4e8   :  { %v353_v57 = vpop.permute.xlu1 %352 }
 0x4e9   :  { %1492 = vmatmul.msk.f32.vlgmr.msra.gmra.mxu3 %vm113_vm5, %v353_v57  ;;  %1495 = vmatmul.msk.f32.vlgmr.msra.gmra.mxu0 %vm113_vm5, %v353_v57 }
 0x4ea   :  { %829 = vmatpush.msra.mxu0 %v1811_v38  ;;  %804 = vmatpush.msra.mxu3 %v1803_v35 }
 0x4ec   :  { %830 = vmatpush.msra.mxu0 %v1817_v40  ;;  %805 = vmatpush.msra.mxu3 %v1805_v36 }
 0x4ee   :  { %v327_v58 = vpop.permute.xlu2 %326  ;;  %831 = vmatpush.msra.mxu0 %v1824_v42  ;;  %806 = vmatpush.msra.mxu3 %v1814_v39 }
 0x4ef   :  { %1491 = vmatmul.msk.f32.vlgmr.msrb.gmra.mxu2 %vm113_vm5, %v327_v58 }
 0x4f0   :  { %737 = vmatpush.msrb.mxu2 %v1768_v0  ;;  %832 = vmatpush.msra.mxu0 %v1830_v43 }
 0x4f1   :  { %807 = vmatpush.msra.mxu3 %v1822_v41 }
 0x4f2   :  { %738 = vmatpush.msrb.mxu2 %v1770_v2 }
 0x4f4   :  { %739 = vmatpush.msrb.mxu2 %v1776_v5 }
 0x4f6   :  { %740 = vmatpush.msrb.mxu2 %v1781_v6 }
 0x566   :  { %v432_v59 = vpop.f32.mrf.mxu0 }
 0x567   :  { %v436_v60 = vrot.slane %v432_v59, 4 }
 0x569   :  { %v438_v61 = vadd.f32 %v436_v60, %v1794_v11 }
 0x56b   :  { %v1496_v62 = vmul.f32 -1.442695, %v438_v61 }
 0x56c   :  { %v373_v63 = vpop.f32.mrf.mxu3 }
 0x56d   :  { %1570 = vpow2.f32 %v1496_v62 }
 0x572   :  { %v347_v1 = vpop.f32.mrf.mxu2 }
 0x573   :  { %v1571_v3 = vpop.eup %1570  ;;  %v374_v4 = vadd.f32 %v373_v63, %v347_v1 }
 0x574   :  { %v442_v7 = vadd.f32 1.0, %v1571_v3 }
 0x575   :  { %v376_v10 = vadd.f32 %v374_v4, %v1870_v49 }
 0x576   :  { %1572 = vrcp.f32 %v442_v7  ;;  %v454_v18 = vand.u32 2147483648, %v442_v7  ;;  %v452_v20 = vand.u32 2147483647, %v442_v7  ;;  %vm448_vm15 = vweird.f32 %v442_v7 }
 0x577   :  { %v1493_v12 = vmul.f32 -1.442695, %v376_v10 }
 0x578   :  { %v455_v22 = vor.u32 1.1754944e-38, %v454_v18  ;;  %vm453_vm1 = vcmp.eq.f32.partialorder %v452_v20, 8.507059e+37 }
 0x579   :  { %1574 = vpow2.f32 %v1493_v12 }
 0x57c   :  { %v1573_v13 = vpop.eup %1572 }
 0x57d   :  { %v444_v14 = vmul.f32 %v1573_v13, %v442_v7  ;;  %vm449_vm14 = vweird.f32 %v1573_v13 }
 0x57e   :  { %vm450_vm0 = vmor %vm448_vm15, %vm449_vm14 }
 0x57f   :  { %v1575_v15 = vpop.eup %1574  ;;  %v445_v16 = vsub.f32 1.0, %v444_v14 }
 0x580   :  { %v380_v17 = vadd.f32 1.0, %v1575_v15 }
 0x581   :  { %v446_v19 = vmul.f32 %v1573_v13, %v445_v16 }
 0x582   :  { %1576 = vrcp.f32 %v380_v17  ;;  %v392_v30 = vand.u32 2147483648, %v380_v17  ;;  %v390_v32 = vand.u32 2147483647, %v380_v17  ;;  %vm386_vm3 = vweird.f32 %v380_v17 }
 0x583   :  { %v447_v21 = vadd.f32 %v1573_v13, %v446_v19 }
 0x584   :  { %v393_v37 = vor.u32 1.1754944e-38, %v392_v30  ;;  %vm391_vm6 = vcmp.eq.f32.partialorder %v390_v32, 8.507059e+37 }
 0x585   :  { %v451_v23 = vsel %vm450_vm0, %v1573_v13, %v447_v21 }
 0x586   :  { %v456_v24 = vsel %vm453_vm1, %v455_v22, %v451_v23 }
 0x587   :  { %v458_v25 = vmul.f32 2.0, %v456_v24  ;;  %v463_v56 = vmul.f32 %v461_v55, %v456_v24 }
 0x588   :  { %v1577_v26 = vpop.eup %1576 }
 0x589   :  { %v382_v27 = vmul.f32 %v1577_v26, %v380_v17  ;;  %v1497_v28 = vadd.f32 -1.0, %v458_v25  ;;  %vm387_vm2 = vweird.f32 %v1577_v26 }
 0x58a   :  { %vm388_vm4 = vmor %vm386_vm3, %vm387_vm2 }
 0x58b   :  { %v383_v29 = vsub.f32 1.0, %v382_v27  ;;  %465 = vrot.lane.b32.xlu0 %v1497_v28, %s1732_s7 }
 0x58d   :  { %v384_v31 = vmul.f32 %v1577_v26, %v383_v29 }
 0x58f   :  { %v385_v34 = vadd.f32 %v1577_v26, %v384_v31 }
 0x591   :  { %v389_v44 = vsel %vm388_vm4, %v1577_v26, %v385_v34 }
 0x592   :  { %v394_v46 = vsel %vm391_vm6, %v393_v37, %v389_v44 }
 0x593   :  { %v396_v48 = vmul.f32 2.0, %v394_v46  ;;  %v398_v60 = vmul.f32 %v394_v46, %v1882_v51 }
 0x595   :  { %v1494_v50 = vadd.f32 -1.0, %v396_v48 }
 0x597   :  { %400 = vrot.lane.b32.xlu1 %v1494_v50, %s1732_s7 }
 0x5fd   :  { %v466_v52 = vpop.permute.xlu0 %465 }
 0x5fe   :  { %v468_v53 = vmul.f32 %v466_v52, %v456_v24 }
 0x600   :  { %470 = vrot.lane.b32.xlu2 %v468_v53, %s1733_s8 }
 0x609   :  { %v401_v33 = vpop.permute.xlu1 %400 }
 0x60a   :  { %v403_v54 = vmul.f32 %v401_v33, %v394_v46 }
 0x60c   :  { %405 = vrot.lane.b32.xlu0 %v403_v54, %s1733_s8 }
 0x65a   :  { %v471_v57 = vpop.permute.xlu2 %470 }
 0x65b   :  { %v1911_v58 = vadd.f32 %v471_v57, %v463_v56 }
 0x65d   :  { %1578 = vtanh.f32 %v1911_v58 }
 0x663   :  { %v1579_v59 = vpop.eup %1578 }
 0x664   :  { %476 = vrot.lane.b32.xlu1 %v1579_v59, %s1732_s7 }
 0x67e   :  { %v406_v61 = vpop.permute.xlu0 %405 }
 0x67f   :  { %v1916_v62 = vadd.f32 %v406_v61, %v398_v60 }
 0x681   :  { %1580 = vtanh.f32 %v1916_v62 }
 0x687   :  { %v1581_v63 = vpop.eup %1580 }
 0x688   :  { %411 = vrot.lane.b32.xlu2 %v1581_v63, %s1732_s7 }
 0x6d6   :  { %v477_v45 = vpop.permute.xlu1 %476 }
 0x6d7   :  { %v479_v1 = vmul.f32 %v477_v45, %v456_v24 }
 0x6d9   :  { %v506_v3 = vrot.slane %v479_v1, 4 }
 0x6db   :  { %507 = vrot.lane.b32.xlu0 %v506_v3, %s1733_s8  ;;  %v616_v3 = vrot.slane %v1911_v58, 6 }
 0x6e2   :  { %v412_v4 = vpop.permute.xlu2 %411 }
 0x6e3   :  { %v414_v7 = vmul.f32 %v412_v4, %v394_v46 }
 0x6e5   :  { %481 = vrot.lane.b32.xlu1 %v414_v7, %s1733_s8 }
 0x74d   :  { %v508_v10 = vpop.permute.xlu0 %507 }
 0x74e   :  { %1499 = vmatmul.msk.f32.vlgmr.msra.gmra.mxu2 %vm113_vm5, %v508_v10  ;;  %1502 = vmatmul.msk.f32.vlgmr.msrb.gmra.mxu3 %vm113_vm5, %v508_v10 }
 0x74f   :  { %984 = vmatpush.msrb.mxu3 %v1811_v38  ;;  %958 = vmatpush.msra.mxu2 %v1803_v35 }
 0x751   :  { %985 = vmatpush.msrb.mxu3 %v1817_v40  ;;  %959 = vmatpush.msra.mxu2 %v1805_v36 }
 0x753   :  { %986 = vmatpush.msrb.mxu3 %v1824_v42  ;;  %960 = vmatpush.msra.mxu2 %v1814_v39 }
 0x755   :  { %987 = vmatpush.msrb.mxu3 %v1830_v43  ;;  %961 = vmatpush.msra.mxu2 %v1822_v41 }
 0x757   :  { %v482_v51 = vpop.permute.xlu1 %481 }
 0x758   :  { %1498 = vmatmul.msk.f32.vlgmr.msra.gmra.mxu1 %vm113_vm5, %v482_v51 }
 0x759   :  { %888 = vmatpush.msra.mxu1 %v1768_v0 }
 0x75b   :  { %889 = vmatpush.msra.mxu1 %v1770_v2 }
 0x75d   :  { %890 = vmatpush.msra.mxu1 %v1776_v5 }
 0x75f   :  { %891 = vmatpush.msra.mxu1 %v1781_v6 }
 0x7d1   :  { %v587_v12 = vpop.f32.mrf.mxu3  ;;  %v528_v15 = vpop.f32.mrf.mxu2 }
 0x7d2   :  { %v591_v13 = vrot.slane %v587_v12, 2 }
 0x7d4   :  { %v593_v14 = vadd.f32 %v591_v13, %v1794_v11 }
 0x7d5   :  { %v502_v16 = vpop.f32.mrf.mxu1 }
 0x7d6   :  { %v1503_v17 = vmul.f32 -1.442695, %v593_v14  ;;  %v529_v18 = vadd.f32 %v528_v15, %v502_v16 }
 0x7d8   :  { %1582 = vpow2.f32 %v1503_v17  ;;  %v531_v19 = vadd.f32 %v529_v18, %v1870_v49 }
 0x7da   :  { %v1500_v20 = vmul.f32 -1.442695, %v531_v19 }
 0x7dc   :  { %1584 = vpow2.f32 %v1500_v20 }
 0x7de   :  { %v1583_v21 = vpop.eup %1582 }
 0x7df   :  { %v597_v22 = vadd.f32 1.0, %v1583_v21  ;;  %v1973_v21 = vadd.f32 %v1867_v47, %v79_v9 }
 0x7e1   :  { %1586 = vrcp.f32 %v597_v22  ;;  %v607_v11 = vand.u32 2147483647, %v597_v22  ;;  %v609_v29 = vand.u32 2147483648, %v597_v22  ;;  %vm603_vm8 = vweird.f32 %v597_v22 }
 0x7e2   :  { %v1585_v23 = vpop.eup %1584 }
 0x7e3   :  { %v535_v24 = vadd.f32 1.0, %v1585_v23  ;;  %vm608_vm10 = vcmp.eq.f32.partialorder %v607_v11, 8.507059e+37  ;;  %v610_v37 = vor.u32 1.1754944e-38, %v609_v29 }
 0x7e5   :  { %1588 = vrcp.f32 %v535_v24  ;;  %v547_v44 = vand.u32 2147483648, %v535_v24  ;;  %v545_v50 = vand.u32 2147483647, %v535_v24  ;;  %vm541_vm12 = vweird.f32 %v535_v24 }
 0x7e7   :  { %v1587_v25 = vpop.eup %1586  ;;  %v548_v54 = vor.u32 1.1754944e-38, %v547_v44  ;;  %vm546_vm14 = vcmp.eq.f32.partialorder %v545_v50, 8.507059e+37 }
 0x7e8   :  { %v599_v26 = vmul.f32 %v1587_v25, %v597_v22  ;;  %vm604_vm7 = vweird.f32 %v1587_v25 }
 0x7e9   :  { %vm605_vm9 = vmor %vm603_vm8, %vm604_vm7 }
 0x7ea   :  { %v600_v27 = vsub.f32 1.0, %v599_v26 }
 0x7eb   :  { %v1589_v28 = vpop.eup %1588 }
 0x7ec   :  { %v537_v30 = vmul.f32 %v1589_v28, %v535_v24  ;;  %v601_v31 = vmul.f32 %v1587_v25, %v600_v27  ;;  %vm542_vm11 = vweird.f32 %v1589_v28 }
 0x7ed   :  { %vm543_vm13 = vmor %vm541_vm12, %vm542_vm11 }
 0x7ee   :  { %v538_v32 = vsub.f32 1.0, %v537_v30  ;;  %v602_v34 = vadd.f32 %v1587_v25, %v601_v31 }
 0x7f0   :  { %v606_v46 = vsel %vm605_vm9, %v1587_v25, %v602_v34  ;;  %v539_v48 = vmul.f32 %v1589_v28, %v538_v32 }
 0x7f1   :  { %v611_v52 = vsel %vm608_vm10, %v610_v37, %v606_v46 }
 0x7f2   :  { %v613_v53 = vmul.f32 2.0, %v611_v52  ;;  %v540_v33 = vadd.f32 %v1589_v28, %v539_v48  ;;  %v618_v4 = vmul.f32 %v616_v3, %v611_v52 }
 0x7f4   :  { %v1504_v55 = vadd.f32 -1.0, %v613_v53  ;;  %v544_v56 = vsel %vm543_vm13, %v1589_v28, %v540_v33 }
 0x7f5   :  { %v549_v57 = vsel %vm546_vm14, %v548_v54, %v544_v56 }
 0x7f6   :  { %620 = vrot.lane.b32.xlu2 %v1504_v55, %s1732_s7  ;;  %v551_v59 = vmul.f32 2.0, %v549_v57  ;;  %v553_v51 = vmul.f32 %v549_v57, %v1916_v62 }
 0x7f8   :  { %v1501_v60 = vadd.f32 -1.0, %v551_v59 }
 0x7fa   :  { %555 = vrot.lane.b32.xlu0 %v1501_v60, %s1732_s7 }
 0x850   :  { %v621_v61 = vpop.permute.xlu2 %620 }
 0x851   :  { %v623_v63 = vmul.f32 %v621_v61, %v611_v52 }
 0x853   :  { %625 = vrot.lane.b32.xlu1 %v623_v63, %s1733_s8 }
 0x86c   :  { %v556_v45 = vpop.permute.xlu0 %555 }
 0x86d   :  { %v558_v1 = vmul.f32 %v556_v45, %v549_v57 }
 0x86f   :  { %560 = vrot.lane.b32.xlu2 %v558_v1, %s1733_s8 }
 0x8c5   :  { %v626_v7 = vpop.permute.xlu1 %625 }
 0x8c6   :  { %v1944_v10 = vadd.f32 %v626_v7, %v618_v4 }
 0x8c8   :  { %1590 = vtanh.f32 %v1944_v10 }
 0x8c9   :  { %v561_v12 = vpop.permute.xlu2 %560 }
 0x8ca   :  { %v1948_v13 = vadd.f32 %v561_v12, %v553_v51 }
 0x8cc   :  { %1592 = vtanh.f32 %v1948_v13 }
 0x8ce   :  { %v1591_v14 = vpop.eup %1590 }
 0x8cf   :  { %631 = vrot.lane.b32.xlu0 %v1591_v14, %s1732_s7 }
 0x8d2   :  { %v1593_v15 = vpop.eup %1592 }
 0x8d3   :  { %566 = vrot.lane.b32.xlu1 %v1593_v15, %s1732_s7  ;;  %v768_v15 = vrot.slane %v1944_v10, 6 }
 0x941   :  { %v632_v58 = vpop.permute.xlu0 %631 }
 0x942   :  { %v634_v16 = vmul.f32 %v632_v58, %v611_v52 }
 0x944   :  { %v661_v17 = vrot.slane %v634_v16, 6 }
 0x945   :  { %v567_v18 = vpop.permute.xlu1 %566 }
 0x946   :  { %v569_v19 = vmul.f32 %v567_v18, %v549_v57  ;;  %662 = vrot.lane.b32.xlu2 %v661_v17, %s1733_s8 }
 0x948   :  { %636 = vrot.lane.b32.xlu0 %v569_v19, %s1733_s8 }
 0x9a0   :  { %v663_v62 = vpop.permute.xlu2 %662 }
 0x9a1   :  { %1506 = vmatmul.msk.f32.vlgmr.msrb.gmra.mxu1 %vm113_vm5, %v663_v62  ;;  %1509 = vmatmul.msk.f32.vlgmr.msrb.gmra.mxu2 %vm113_vm5, %v663_v62 }
 0x9a2   :  { %1139 = vmatpush.msrb.mxu2 %v1811_v38  ;;  %1113 = vmatpush.msrb.mxu1 %v1803_v35 }
 0x9a4   :  { %1140 = vmatpush.msrb.mxu2 %v1817_v40  ;;  %1114 = vmatpush.msrb.mxu1 %v1805_v36 }
 0x9a6   :  { %1141 = vmatpush.msrb.mxu2 %v1824_v42  ;;  %1115 = vmatpush.msrb.mxu1 %v1814_v39 }
 0x9a8   :  { %1142 = vmatpush.msrb.mxu2 %v1830_v43  ;;  %1116 = vmatpush.msrb.mxu1 %v1822_v41 }
 0x9ba   :  { %v637_v20 = vpop.permute.xlu0 %636 }
 0x9bb   :  { %1505 = vmatmul.msk.f32.vlgmr.msrb.gmra.mxu0 %vm113_vm5, %v637_v20 }
 0x9bc   :  { %1043 = vmatpush.msrb.mxu0 %v1768_v0 }
 0x9be   :  { %1044 = vmatpush.msrb.mxu0 %v1770_v2 }
 0x9c0   :  { %1045 = vmatpush.msrb.mxu0 %v1776_v5 }
 0x9c2   :  { %1046 = vmatpush.msrb.mxu0 %v1781_v6 }
 0xa1e   :  { %v683_v28 = vpop.f32.mrf.mxu1 }
 0xa24   :  { %v742_v22 = vpop.f32.mrf.mxu2 }
 0xa25   :  { %v745_v23 = vadd.f32 %v742_v22, %v1973_v21 }
 0xa27   :  { %v1510_v24 = vmul.f32 -1.442695, %v745_v23 }
 0xa29   :  { %1594 = vpow2.f32 %v1510_v24 }
 0xa2f   :  { %v1595_v25 = vpop.eup %1594 }
 0xa30   :  { %v749_v26 = vadd.f32 1.0, %v1595_v25 }
 0xa32   :  { %1596 = vrcp.f32 %v749_v26  ;;  %v761_v8 = vand.u32 2147483648, %v749_v26  ;;  %v759_v47 = vand.u32 2147483647, %v749_v26  ;;  %vm755_vm0 = vweird.f32 %v749_v26 }
 0xa34   :  { %v762_v44 = vor.u32 1.1754944e-38, %v761_v8  ;;  %vm760_vm2 = vcmp.eq.f32.partialorder %v759_v47, 8.507059e+37 }
 0xa38   :  { %v1597_v27 = vpop.eup %1596  ;;  %v657_v11 = vpop.f32.mrf.mxu0 }
 0xa39   :  { %v751_v29 = vmul.f32 %v1597_v27, %v749_v26  ;;  %v684_v30 = vadd.f32 %v683_v28, %v657_v11  ;;  %vm756_vm15 = vweird.f32 %v1597_v27 }
 0xa3a   :  { %vm757_vm1 = vmor %vm755_vm0, %vm756_vm15 }
 0xa3b   :  { %v752_v31 = vsub.f32 1.0, %v751_v29  ;;  %v686_v32 = vadd.f32 %v684_v30, %v1870_v49 }
 0xa3d   :  { %v1507_v34 = vmul.f32 -1.442695, %v686_v32  ;;  %v753_v9 = vmul.f32 %v1597_v27, %v752_v31 }
 0xa3f   :  { %1598 = vpow2.f32 %v1507_v34  ;;  %v754_v37 = vadd.f32 %v1597_v27, %v753_v9 }
 0xa41   :  { %v758_v46 = vsel %vm757_vm1, %v1597_v27, %v754_v37 }
 0xa42   :  { %v763_v48 = vsel %vm760_vm2, %v762_v44, %v758_v46 }
 0xa43   :  { %v765_v50 = vmul.f32 2.0, %v763_v48  ;;  %v770_v58 = vmul.f32 %v768_v15, %v763_v48 }
 0xa45   :  { %v1599_v52 = vpop.eup %1598  ;;  %v1511_v53 = vadd.f32 -1.0, %v765_v50 }
 0xa46   :  { %v690_v33 = vadd.f32 1.0, %v1599_v52 }
 0xa47   :  { %772 = vrot.lane.b32.xlu2 %v1511_v53, %s1732_s7 }
 0xa48   :  { %1600 = vrcp.f32 %v690_v33  ;;  %v702_v57 = vand.u32 2147483648, %v690_v33  ;;  %v700_v60 = vand.u32 2147483647, %v690_v33  ;;  %vm696_vm4 = vweird.f32 %v690_v33 }
 0xa4a   :  { %v703_v63 = vor.u32 1.1754944e-38, %v702_v57  ;;  %vm701_vm7 = vcmp.eq.f32.partialorder %v700_v60, 8.507059e+37 }
 0xa4e   :  { %v1601_v54 = vpop.eup %1600 }
 0xa4f   :  { %v692_v55 = vmul.f32 %v1601_v54, %v690_v33  ;;  %vm697_vm3 = vweird.f32 %v1601_v54 }
 0xa50   :  { %vm698_vm6 = vmor %vm696_vm4, %vm697_vm3 }
 0xa51   :  { %v693_v56 = vsub.f32 1.0, %v692_v55 }
 0xa53   :  { %v694_v59 = vmul.f32 %v1601_v54, %v693_v56 }
 0xa55   :  { %v695_v61 = vadd.f32 %v1601_v54, %v694_v59 }
 0xa57   :  { %v699_v45 = vsel %vm698_vm6, %v1601_v54, %v695_v61 }
 0xa58   :  { %v704_v1 = vsel %vm701_vm7, %v703_v63, %v699_v45 }
 0xa59   :  { %v706_v3 = vmul.f32 2.0, %v704_v1  ;;  %v708_v19 = vmul.f32 %v704_v1, %v1948_v13 }
 0xa5b   :  { %v1508_v4 = vadd.f32 -1.0, %v706_v3 }
 0xa5d   :  { %710 = vrot.lane.b32.xlu1 %v1508_v4, %s1732_s7 }
 0xaa1   :  { %v773_v7 = vpop.permute.xlu2 %772 }
 0xaa2   :  { %v775_v51 = vmul.f32 %v773_v7, %v763_v48 }
 0xaa4   :  { %777 = vrot.lane.b32.xlu1 %v775_v51, %s1733_s8 }
 0xacf   :  { %v711_v12 = vpop.permute.xlu1 %710 }
 0xad0   :  { %v713_v14 = vmul.f32 %v711_v12, %v704_v1 }
 0xad2   :  { %715 = vrot.lane.b32.xlu0 %v713_v14, %s1733_s8 }
 0xb16   :  { %v778_v16 = vpop.permute.xlu1 %777 }
 0xb17   :  { %v1982_v17 = vadd.f32 %v778_v16, %v770_v58 }
 0xb19   :  { %1602 = vtanh.f32 %v1982_v17  ;;  %v922_v3 = vrot.slane %v1982_v17, 6 }
 0xb1f   :  { %v1603_v18 = vpop.eup %1602 }
 0xb20   :  { %783 = vrot.lane.b32.xlu0 %v1603_v18, %s1732_s7 }
 0xb44   :  { %v716_v62 = vpop.permute.xlu0 %715 }
 0xb45   :  { %v1987_v20 = vadd.f32 %v716_v62, %v708_v19 }
 0xb47   :  { %1604 = vtanh.f32 %v1987_v20 }
 0xb4d   :  { %v1605_v22 = vpop.eup %1604 }
 0xb4e   :  { %721 = vrot.lane.b32.xlu2 %v1605_v22, %s1732_s7 }
 0xb92   :  { %v784_v10 = vpop.permute.xlu0 %783 }
 0xb93   :  { %v786_v23 = vmul.f32 %v784_v10, %v763_v48 }
 0xb95   :  { %813 = vrot.lane.b32.xlu2 %v786_v23, %s1733_s8 }
 0xba8   :  { %v722_v24 = vpop.permute.xlu2 %721 }
 0xba9   :  { %v724_v25 = vmul.f32 %v722_v24, %v704_v1 }
 0xbab   :  { %788 = vrot.lane.b32.xlu1 %v724_v25, %s1733_s8 }
 0xbef   :  { %v814_v26 = vpop.permute.xlu2 %813 }
 0xbf0   :  { %1513 = vmatmul.msk.f32.vlgmr.msra.gmra.mxu0 %vm113_vm5, %v814_v26  ;;  %1516 = vmatmul.msk.f32.vlgmr.msra.gmra.mxu1 %vm113_vm5, %v814_v26 }
 0xbf1   :  { %1294 = vmatpush.msra.mxu1 %v1811_v38  ;;  %1268 = vmatpush.msra.mxu0 %v1803_v35 }
 0xbf3   :  { %1295 = vmatpush.msra.mxu1 %v1817_v40  ;;  %1269 = vmatpush.msra.mxu0 %v1805_v36 }
 0xbf5   :  { %1296 = vmatpush.msra.mxu1 %v1824_v42  ;;  %1270 = vmatpush.msra.mxu0 %v1814_v39 }
 0xbf7   :  { %1297 = vmatpush.msra.mxu1 %v1830_v43  ;;  %1271 = vmatpush.msra.mxu0 %v1822_v41 }
 0xc1d   :  { %v789_v13 = vpop.permute.xlu1 %788 }
 0xc1e   :  { %1512 = vmatmul.msk.f32.vlgmr.msra.gmra.mxu3 %vm113_vm5, %v789_v13 }
 0xc1f   :  { %1198 = vmatpush.msra.mxu3 %v1768_v0 }
 0xc21   :  { %1199 = vmatpush.msra.mxu3 %v1770_v2 }
 0xc23   :  { %1200 = vmatpush.msra.mxu3 %v1776_v5 }
 0xc25   :  { %1201 = vmatpush.msra.mxu3 %v1781_v6 }
 0xc6d   :  { %v893_v35 = vpop.f32.mrf.mxu1  ;;  %v834_v32 = vpop.f32.mrf.mxu0 }
 0xc6e   :  { %v897_v36 = vrot.slane %v893_v35, 6 }
 0xc70   :  { %v899_v38 = vadd.f32 %v897_v36, %v1973_v21 }
 0xc72   :  { %v1517_v39 = vmul.f32 -1.442695, %v899_v38 }
 0xc74   :  { %1606 = vpow2.f32 %v1517_v39 }
 0xc7a   :  { %v1607_v40 = vpop.eup %1606 }
 0xc7b   :  { %v903_v42 = vadd.f32 1.0, %v1607_v40 }
 0xc7d   :  { %1608 = vrcp.f32 %v903_v42  ;;  %v915_v28 = vand.u32 2147483648, %v903_v42  ;;  %v913_v2 = vand.u32 2147483647, %v903_v42  ;;  %vm909_vm9 = vweird.f32 %v903_v42 }
 0xc7f   :  { %v916_v5 = vor.u32 1.1754944e-38, %v915_v28  ;;  %vm914_vm11 = vcmp.eq.f32.partialorder %v913_v2, 8.507059e+37 }
 0xc83   :  { %v1609_v41 = vpop.eup %1608 }
 0xc84   :  { %v905_v43 = vmul.f32 %v1609_v41, %v903_v42  ;;  %vm910_vm8 = vweird.f32 %v1609_v41 }
 0xc85   :  { %vm911_vm10 = vmor %vm909_vm9, %vm910_vm8 }
 0xc86   :  { %v906_v27 = vsub.f32 1.0, %v905_v43 }
 0xc88   :  { %v907_v0 = vmul.f32 %v1609_v41, %v906_v27 }
 0xc8a   :  { %v908_v11 = vadd.f32 %v1609_v41, %v907_v0 }
 0xc8c   :  { %v912_v6 = vsel %vm911_vm10, %v1609_v41, %v908_v11 }
 0xc8d   :  { %v917_v29 = vsel %vm914_vm11, %v916_v5, %v912_v6 }
 0xc8e   :  { %v919_v30 = vmul.f32 2.0, %v917_v29  ;;  %v924_v4 = vmul.f32 %v922_v3, %v917_v29 }
 0xc90   :  { %v1518_v31 = vadd.f32 -1.0, %v919_v30 }
 0xc92   :  { %926 = vrot.lane.b32.xlu0 %v1518_v31, %s1732_s7 }
 0xca1   :  { %v809_v8 = vpop.f32.mrf.mxu3 }
 0xca2   :  { %v835_v34 = vadd.f32 %v834_v32, %v809_v8 }
 0xca4   :  { %v837_v9 = vadd.f32 %v835_v34, %v1870_v49 }
 0xca6   :  { %v1514_v47 = vmul.f32 -1.442695, %v837_v9 }
 0xca8   :  { %1610 = vpow2.f32 %v1514_v47 }
 0xcae   :  { %v1611_v37 = vpop.eup %1610 }
 0xcaf   :  { %v841_v44 = vadd.f32 1.0, %v1611_v37 }
 0xcb1   :  { %1612 = vrcp.f32 %v841_v44  ;;  %v853_v52 = vand.u32 2147483648, %v841_v44  ;;  %v851_v33 = vand.u32 2147483647, %v841_v44  ;;  %vm847_vm13 = vweird.f32 %v841_v44 }
 0xcb3   :  { %v854_v55 = vor.u32 1.1754944e-38, %v853_v52  ;;  %vm852_vm15 = vcmp.eq.f32.partialorder %v851_v33, 8.507059e+37 }
 0xcb7   :  { %v1613_v46 = vpop.eup %1612 }
 0xcb8   :  { %v843_v48 = vmul.f32 %v1613_v46, %v841_v44  ;;  %vm848_vm12 = vweird.f32 %v1613_v46 }
 0xcb9   :  { %vm849_vm14 = vmor %vm847_vm13, %vm848_vm12 }
 0xcba   :  { %v844_v50 = vsub.f32 1.0, %v843_v48 }
 0xcbc   :  { %v845_v53 = vmul.f32 %v1613_v46, %v844_v50 }
 0xcbe   :  { %v846_v54 = vadd.f32 %v1613_v46, %v845_v53 }
 0xcc0   :  { %v850_v56 = vsel %vm849_vm14, %v1613_v46, %v846_v54 }
 0xcc1   :  { %v855_v57 = vsel %vm852_vm15, %v854_v55, %v850_v56 }
 0xcc2   :  { %v857_v59 = vmul.f32 2.0, %v855_v57  ;;  %v859_v14 = vmul.f32 %v855_v57, %v1987_v20 }
 0xcc4   :  { %v1515_v60 = vadd.f32 -1.0, %v857_v59 }
 0xcc6   :  { %861 = vrot.lane.b32.xlu1 %v1515_v60, %s1732_s7 }
 0xd04   :  { %v927_v61 = vpop.permute.xlu0 %926 }
 0xd05   :  { %v929_v63 = vmul.f32 %v927_v61, %v917_v29 }
 0xd07   :  { %931 = vrot.lane.b32.xlu2 %v929_v63, %s1733_s8 }
 0xd38   :  { %v862_v45 = vpop.permute.xlu1 %861 }
 0xd39   :  { %v864_v1 = vmul.f32 %v862_v45, %v855_v57 }
 0xd3b   :  { %866 = vrot.lane.b32.xlu0 %v864_v1, %s1733_s8 }
 0xd61   :  { %v932_v7 = vpop.permute.xlu2 %931 }
 0xd62   :  { %v2015_v51 = vadd.f32 %v932_v7, %v924_v4 }
 0xd64   :  { %1614 = vtanh.f32 %v2015_v51  ;;  %v1077_v60 = vrot.slane %v2015_v51, 6 }
 0xd6a   :  { %v1615_v12 = vpop.eup %1614 }
 0xd6b   :  { %937 = vrot.lane.b32.xlu1 %v1615_v12, %s1732_s7 }
 0xdad   :  { %v867_v15 = vpop.permute.xlu0 %866 }
 0xdae   :  { %v2020_v58 = vadd.f32 %v867_v15, %v859_v14 }
 0xdb0   :  { %1616 = vtanh.f32 %v2020_v58 }
 0xdb6   :  { %v1617_v16 = vpop.eup %1616 }
 0xdb7   :  { %872 = vrot.lane.b32.xlu2 %v1617_v16, %s1732_s7 }
 0xddd   :  { %v938_v17 = vpop.permute.xlu1 %937 }
 0xdde   :  { %v940_v18 = vmul.f32 %v938_v17, %v917_v29 }
 0xde0   :  { %v967_v19 = vrot.slane %v940_v18, 2 }
 0xde2   :  { %968 = vrot.lane.b32.xlu0 %v967_v19, %s1733_s8 }
 0xe11   :  { %v873_v62 = vpop.permute.xlu2 %872 }
 0xe12   :  { %v875_v22 = vmul.f32 %v873_v62, %v855_v57 }
 0xe14   :  { %942 = vrot.lane.b32.xlu1 %v875_v22, %s1733_s8 }
 0xe54   :  { %v969_v10 = vpop.permute.xlu0 %968 }
 0xe55   :  { %1520 = vmatmul.msk.f32.vlgmr.msrb.gmra.mxu3 %vm113_vm5, %v969_v10  ;;  %1523 = vmatmul.msk.f32.vlgmr.msrb.gmra.mxu0 %vm113_vm5, %v969_v10 }
 0xe86   :  { %v943_v20 = vpop.permute.xlu1 %942 }
 0xe87   :  { %1519 = vmatmul.msk.f32.vlgmr.msra.gmra.mxu2 %vm113_vm5, %v943_v20 }
 0xed2   :  { %v1048_v23 = vpop.f32.mrf.mxu0 }
 0xed3   :  { %v1052_v24 = vrot.slane %v1048_v23, 4 }
 0xed5   :  { %v1054_v25 = vadd.f32 %v1052_v24, %v1973_v21 }
 0xed7   :  { %v1524_v26 = vmul.f32 -1.442695, %v1054_v25 }
 0xed8   :  { %v989_v5 = vpop.f32.mrf.mxu3 }
 0xed9   :  { %1618 = vpow2.f32 %v1524_v26 }
 0xedf   :  { %v1619_v13 = vpop.eup %1618 }
 0xee0   :  { %v1058_v35 = vadd.f32 1.0, %v1619_v13 }
 0xee2   :  { %1620 = vrcp.f32 %v1058_v35  ;;  %v1070_v40 = vand.u32 2147483648, %v1058_v35  ;;  %v1068_v41 = vand.u32 2147483647, %v1058_v35  ;;  %vm1064_vm1 = vweird.f32 %v1058_v35 }
 0xee4   :  { %v1071_v27 = vor.u32 1.1754944e-38, %v1070_v40  ;;  %vm1069_vm3 = vcmp.eq.f32.partialorder %v1068_v41, 8.507059e+37 }
 0xee8   :  { %v1621_v36 = vpop.eup %1620 }
 0xee9   :  { %v1060_v38 = vmul.f32 %v1621_v36, %v1058_v35  ;;  %vm1065_vm0 = vweird.f32 %v1621_v36 }
 0xeea   :  { %vm1066_vm2 = vmor %vm1064_vm1, %vm1065_vm0 }
 0xeeb   :  { %v1061_v39 = vsub.f32 1.0, %v1060_v38 }
 0xeed   :  { %v1062_v42 = vmul.f32 %v1621_v36, %v1061_v39 }
 0xeef   :  { %v1063_v43 = vadd.f32 %v1621_v36, %v1062_v42 }
 0xef1   :  { %v1067_v28 = vsel %vm1066_vm2, %v1621_v36, %v1063_v43 }
 0xef2   :  { %v1072_v0 = vsel %vm1069_vm3, %v1071_v27, %v1067_v28 }
 0xef3   :  { %v1074_v2 = vmul.f32 2.0, %v1072_v0  ;;  %v1079_v61 = vmul.f32 %v1077_v60, %v1072_v0 }
 0xef5   :  { %v1525_v11 = vadd.f32 -1.0, %v1074_v2 }
 0xef7   :  { %1081 = vrot.lane.b32.xlu2 %v1525_v11, %s1732_s7 }
 0xf0a   :  { %v963_v6 = vpop.f32.mrf.mxu2 }
 0xf0b   :  { %v990_v29 = vadd.f32 %v989_v5, %v963_v6 }
 0xf0d   :  { %v992_v30 = vadd.f32 %v990_v29, %v1870_v49 }
 0xf0f   :  { %v1521_v31 = vmul.f32 -1.442695, %v992_v30 }
 0xf11   :  { %1622 = vpow2.f32 %v1521_v31 }
 0xf17   :  { %v1623_v32 = vpop.eup %1622 }
 0xf18   :  { %v996_v8 = vadd.f32 1.0, %v1623_v32 }
 0xf1a   :  { %1624 = vrcp.f32 %v996_v8  ;;  %v1008_v37 = vand.u32 2147483648, %v996_v8  ;;  %v1006_v46 = vand.u32 2147483647, %v996_v8  ;;  %vm1002_vm6 = vweird.f32 %v996_v8 }
 0xf1c   :  { %v1009_v50 = vor.u32 1.1754944e-38, %v1008_v37  ;;  %vm1007_vm8 = vcmp.eq.f32.partialorder %v1006_v46, 8.507059e+37 }
 0xf20   :  { %v1625_v34 = vpop.eup %1624 }
 0xf21   :  { %v998_v9 = vmul.f32 %v1625_v34, %v996_v8  ;;  %vm1003_vm4 = vweird.f32 %v1625_v34 }
 0xf22   :  { %vm1004_vm7 = vmor %vm1002_vm6, %vm1003_vm4 }
 0xf23   :  { %v999_v47 = vsub.f32 1.0, %v998_v9 }
 0xf25   :  { %v1000_v44 = vmul.f32 %v1625_v34, %v999_v47 }
 0xf27   :  { %v1001_v48 = vadd.f32 %v1625_v34, %v1000_v44 }
 0xf29   :  { %v1005_v52 = vsel %vm1004_vm7, %v1625_v34, %v1001_v48 }
 0xf2a   :  { %v1010_v53 = vsel %vm1007_vm8, %v1009_v50, %v1005_v52 }
 0xf2b   :  { %v1012_v33 = vmul.f32 2.0, %v1010_v53  ;;  %v1014_v3 = vmul.f32 %v1010_v53, %v2020_v58 }
 0xf2d   :  { %v1522_v54 = vadd.f32 -1.0, %v1012_v33 }
 0xf2f   :  { %1016 = vrot.lane.b32.xlu0 %v1522_v54, %s1732_s7 }
 0xf51   :  { %v1082_v55 = vpop.permute.xlu2 %1081 }
 0xf52   :  { %v1084_v56 = vmul.f32 %v1082_v55, %v1072_v0 }
 0xf54   :  { %1086 = vrot.lane.b32.xlu1 %v1084_v56, %s1733_s8 }
 0xfa1   :  { %v1017_v57 = vpop.permute.xlu0 %1016 }
 0xfa2   :  { %v1019_v59 = vmul.f32 %v1017_v57, %v1010_v53 }
 0xfa4   :  { %1021 = vrot.lane.b32.xlu2 %v1019_v59, %s1733_s8 }
 0xfc6   :  { %v1087_v63 = vpop.permute.xlu1 %1086 }
 0xfc7   :  { %v2036_v45 = vadd.f32 %v1087_v63, %v1079_v61 }
 0xfc9   :  { %1626 = vtanh.f32 %v2036_v45  ;;  %v1232_v33 = vrot.slane %v2036_v45, 6 }
 0xfcf   :  { %v1627_v1 = vpop.eup %1626 }
 0xfd0   :  { %1092 = vrot.lane.b32.xlu0 %v1627_v1, %s1732_s7 }
 0xffe   :  { %v1022_v4 = vpop.permute.xlu2 %1021 }
 0xfff   :  { %v2041_v7 = vadd.f32 %v1022_v4, %v1014_v3 }
0x1001   :  { %1628 = vtanh.f32 %v2041_v7 }
0x1007   :  { %v1629_v12 = vpop.eup %1628 }
0x1008   :  { %1027 = vrot.lane.b32.xlu1 %v1629_v12, %s1732_s7 }
0x1042   :  { %v1093_v51 = vpop.permute.xlu0 %1092 }
0x1043   :  { %v1095_v14 = vmul.f32 %v1093_v51, %v1072_v0 }
0x1045   :  { %v1122_v15 = vrot.slane %v1095_v14, 4 }
0x1047   :  { %1123 = vrot.lane.b32.xlu2 %v1122_v15, %s1733_s8 }
0x107a   :  { %v1028_v16 = vpop.permute.xlu1 %1027 }
0x107b   :  { %v1030_v17 = vmul.f32 %v1028_v16, %v1010_v53 }
0x107d   :  { %1097 = vrot.lane.b32.xlu0 %v1030_v17, %s1733_s8 }
0x10a1   :  { %v1124_v18 = vpop.permute.xlu2 %1123 }
0x10a2   :  { %1527 = vmatmul.msk.f32.vlgmr.msrb.gmra.mxu2 %vm113_vm5, %v1124_v18  ;;  %1530 = vmatmul.msk.f32.vlgmr.msra.gmra.mxu3 %vm113_vm5, %v1124_v18 }
0x10ef   :  { %v1098_v58 = vpop.permute.xlu0 %1097 }
0x10f0   :  { %1526 = vmatmul.msk.f32.vlgmr.msrb.gmra.mxu1 %vm113_vm5, %v1098_v58 }
0x1125   :  { %v1203_v19 = vpop.f32.mrf.mxu3  ;;  %v1144_v43 = vpop.f32.mrf.mxu2 }
0x1126   :  { %v1207_v62 = vrot.slane %v1203_v19, 2 }
0x1128   :  { %v1209_v22 = vadd.f32 %v1207_v62, %v1973_v21 }
0x112a   :  { %v1531_v10 = vmul.f32 -1.442695, %v1209_v22 }
0x112c   :  { %1630 = vpow2.f32 %v1531_v10 }
0x1132   :  { %v1631_v20 = vpop.eup %1630 }
0x1133   :  { %v1213_v23 = vadd.f32 1.0, %v1631_v20 }
0x1135   :  { %1632 = vrcp.f32 %v1213_v23  ;;  %v1225_v13 = vand.u32 2147483648, %v1213_v23  ;;  %v1223_v36 = vand.u32 2147483647, %v1213_v23  ;;  %vm1219_vm10 = vweird.f32 %v1213_v23 }
0x1137   :  { %v1226_v39 = vor.u32 1.1754944e-38, %v1225_v13  ;;  %vm1224_vm12 = vcmp.eq.f32.partialorder %v1223_v36, 8.507059e+37 }
0x113b   :  { %v1633_v24 = vpop.eup %1632 }
0x113c   :  { %v1215_v25 = vmul.f32 %v1633_v24, %v1213_v23  ;;  %vm1220_vm9 = vweird.f32 %v1633_v24 }
0x113d   :  { %vm1221_vm11 = vmor %vm1219_vm10, %vm1220_vm9 }
0x113e   :  { %v1216_v26 = vsub.f32 1.0, %v1215_v25 }
0x1140   :  { %v1217_v35 = vmul.f32 %v1633_v24, %v1216_v26 }
0x1142   :  { %v1218_v38 = vadd.f32 %v1633_v24, %v1217_v35 }
0x1144   :  { %v1222_v40 = vsel %vm1221_vm11, %v1633_v24, %v1218_v38 }
0x1145   :  { %v1227_v42 = vsel %vm1224_vm12, %v1226_v39, %v1222_v40 }
0x1146   :  { %v1229_v21 = vmul.f32 2.0, %v1227_v42  ;;  %v1234_v54 = vmul.f32 %v1232_v33, %v1227_v42  ;;  %v1378_v33 = vld [vmem:[#allocation6 + $0xc8] sm:$0xff] }
0x1148   :  { %v1532_v41 = vadd.f32 -1.0, %v1229_v21 }
0x114a   :  { %1236 = vrot.lane.b32.xlu1 %v1532_v41, %s1732_s7 }
0x116d   :  { %v1118_v27 = vpop.f32.mrf.mxu1 }
0x116e   :  { %v1145_v28 = vadd.f32 %v1144_v43, %v1118_v27  ;;  %v1347_v43 = vld [vmem:[#allocation4 + $0x30] sm:$0xff]  ;;  %v1348_v27 = vld [vmem:[#allocation4 + $0x38] sm:$0xff] }
0x116f   :  { %1404 = vmatpush.msra.mxu2 %v1347_v43  ;;  %1424 = vmatpush.msrb.mxu3 %v1348_v27 }
0x1170   :  { %v1147_v0 = vadd.f32 %v1145_v28, %v1870_v49  ;;  %v1345_v28 = vld [vmem:[#allocation4 + $0x20] sm:$0xff] }
0x1171   :  { %1405 = vmatpush.msra.mxu2 %v1345_v28 }
0x1172   :  { %v1528_v2 = vmul.f32 -1.442695, %v1147_v0  ;;  %v1346_v0 = vld [vmem:[#allocation4 + $0x28] sm:$0xff] }
0x1173   :  { %1425 = vmatpush.msrb.mxu3 %v1346_v0 }
0x1174   :  { %1634 = vpow2.f32 %v1528_v2  ;;  %v1343_v2 = vld [vmem:[#allocation4 + $0x10] sm:$0xff] }
0x1175   :  { %1406 = vmatpush.msra.mxu2 %v1343_v2 }
0x117a   :  { %v1635_v11 = vpop.eup %1634 }
0x117b   :  { %v1151_v5 = vadd.f32 1.0, %v1635_v11  ;;  %v1344_v11 = vld [vmem:[#allocation4 + $0x18] sm:$0xff] }
0x117c   :  { %1426 = vmatpush.msrb.mxu3 %v1344_v11 }
0x117d   :  { %1636 = vrcp.f32 %v1151_v5  ;;  %v1163_v31 = vand.u32 2147483648, %v1151_v5  ;;  %v1161_v8 = vand.u32 2147483647, %v1151_v5  ;;  %vm1157_vm14 = vweird.f32 %v1151_v5 }
0x117f   :  { %v1164_v9 = vor.u32 1.1754944e-38, %v1163_v31  ;;  %vm1162_vm0 = vcmp.eq.f32.partialorder %v1161_v8, 8.507059e+37  ;;  %v1368_v31 = vld [vmem:[#allocation6 + $0x78] sm:$0xff]  ;;  %v1367_v8 = vld [vmem:[#allocation6 + $0x70] sm:$0xff] }
0x1180   :  { %1434 = vmatpush.msrb.mxu0 %v1368_v31 }
0x1182   :  { %1435 = vmatpush.msrb.mxu0 %v1367_v8 }
0x1183   :  { %v1637_v6 = vpop.eup %1636 }
0x1184   :  { %v1153_v29 = vmul.f32 %v1637_v6, %v1151_v5  ;;  %vm1158_vm13 = vweird.f32 %v1637_v6  ;;  %v1341_v5 = vld [vmem:[#allocation4] sm:$0xff] }
0x1185   :  { %vm1159_vm15 = vmor %vm1157_vm14, %vm1158_vm13  ;;  %1407 = vmatpush.msra.mxu2 %v1341_v5 }
0x1186   :  { %v1154_v30 = vsub.f32 1.0, %v1153_v29 }
0x1188   :  { %v1155_v32 = vmul.f32 %v1637_v6, %v1154_v30 }
0x118a   :  { %v1156_v34 = vadd.f32 %v1637_v6, %v1155_v32  ;;  %v1384_v32 = vld [vmem:[#allocation6 + $0xf8] sm:$0xff] }
0x118b   :  { %1454 = vmatpush.msrb.mxu1 %v1384_v32 }
0x118c   :  { %v1160_v47 = vsel %vm1159_vm15, %v1637_v6, %v1156_v34  ;;  %v1342_v6 = vld [vmem:[#allocation4 + $0x8] sm:$0xff]  ;;  %v1383_v34 = vld [vmem:[#allocation6 + $0xf0] sm:$0xff] }
0x118d   :  { %v1165_v37 = vsel %vm1162_vm0, %v1164_v9, %v1160_v47  ;;  %1427 = vmatpush.msrb.mxu3 %v1342_v6  ;;  %v1366_v9 = vld [vmem:[#allocation6 + $0x68] sm:$0xff]  ;;  %1455 = vmatpush.msrb.mxu1 %v1383_v34 }
0x118e   :  { %v1167_v44 = vmul.f32 2.0, %v1165_v37  ;;  %v1169_v59 = vmul.f32 %v1165_v37, %v2041_v7  ;;  %v1382_v47 = vld [vmem:[#allocation6 + $0xe8] sm:$0xff]  ;;  %1436 = vmatpush.msrb.mxu0 %v1366_v9 }
0x118f   :  { %1456 = vmatpush.msrb.mxu1 %v1382_v47 }
0x1190   :  { %v1529_v46 = vadd.f32 -1.0, %v1167_v44  ;;  %v1381_v44 = vld [vmem:[#allocation6 + $0xe0] sm:$0xff] }
0x1191   :  { %1457 = vmatpush.msrb.mxu1 %v1381_v44 }
0x1192   :  { %1171 = vrot.lane.b32.xlu2 %v1529_v46, %s1732_s7  ;;  %v1364_v46 = vld [vmem:[#allocation6 + $0x58] sm:$0xff] }
0x11bc   :  { %v1237_v48 = vpop.permute.xlu1 %1236 }
0x11bd   :  { %v1239_v50 = vmul.f32 %v1237_v48, %v1227_v42  ;;  %v1380_v48 = vld [vmem:[#allocation6 + $0xd8] sm:$0xff] }
0x11be   :  { %1458 = vmatpush.msrb.mxu1 %v1380_v48 }
0x11bf   :  { %1241 = vrot.lane.b32.xlu0 %v1239_v50, %s1733_s8  ;;  %v1363_v50 = vld [vmem:[#allocation6 + $0x50] sm:$0xff] }
0x11ec   :  { %v1172_v52 = vpop.permute.xlu2 %1171 }
0x11ed   :  { %v1174_v53 = vmul.f32 %v1172_v52, %v1165_v37  ;;  %v1379_v52 = vld [vmem:[#allocation6 + $0xd0] sm:$0xff] }
0x11ee   :  { %1459 = vmatpush.msrb.mxu1 %v1379_v52 }
0x11ef   :  { %1176 = vrot.lane.b32.xlu1 %v1174_v53, %s1733_s8  ;;  %v1362_v53 = vld [vmem:[#allocation6 + $0x48] sm:$0xff] }
0x11f0   :  { %1460 = vmatpush.msrb.mxu1 %v1378_v33 }
0x1231   :  { %v1242_v55 = vpop.permute.xlu0 %1241 }
0x1232   :  { %v1244_v56 = vadd.f32 %v1242_v55, %v1234_v54  ;;  %v1361_v54 = vld [vmem:[#allocation6 + $0x40] sm:$0xff] }
0x1233   :  { %v1377_v55 = vld [vmem:[#allocation6 + $0xc0] sm:$0xff] }
0x1234   :  { %1638 = vtanh.f32 %v1244_v56  ;;  %v1360_v56 = vld [vmem:[#allocation6 + $0x38] sm:$0xff]  ;;  %1461 = vmatpush.msrb.mxu1 %v1377_v55 }
0x123a   :  { %v1639_v57 = vpop.eup %1638 }
0x123b   :  { %1247 = vrot.lane.b32.xlu2 %v1639_v57, %s1732_s7  ;;  %v1376_v57 = vld [vmem:[#allocation6 + $0xb8] sm:$0xff] }
0x123c   :  { %1462 = vmatpush.msrb.mxu1 %v1376_v57 }
0x1261   :  { %v1177_v60 = vpop.permute.xlu1 %1176 }
0x1262   :  { %v1179_v61 = vadd.f32 %v1177_v60, %v1169_v59  ;;  %v1359_v59 = vld [vmem:[#allocation6 + $0x30] sm:$0xff] }
0x1263   :  { %v1375_v60 = vld [vmem:[#allocation6 + $0xb0] sm:$0xff] }
0x1264   :  { %1640 = vtanh.f32 %v1179_v61  ;;  %1463 = vmatpush.msrb.mxu1 %v1375_v60 }
0x126a   :  { %v1641_v63 = vpop.eup %1640 }
0x126b   :  { %1182 = vrot.lane.b32.xlu0 %v1641_v63, %s1732_s7  ;;  %v1374_v63 = vld [vmem:[#allocation6 + $0xa8] sm:$0xff] }
0x126c   :  { %1464 = vmatpush.msrb.mxu1 %v1374_v63 }
0x1295   :  { %v1248_v1 = vpop.permute.xlu2 %1247 }
0x1296   :  { %v1250_v3 = vmul.f32 %v1248_v1, %v1227_v42  ;;  %v1357_v1 = vld [vmem:[#allocation6 + $0x20] sm:$0xff] }
0x1298   :  { %v1277_v4 = vrot.slane %v1250_v3, 6  ;;  %v1373_v3 = vld [vmem:[#allocation6 + $0xa0] sm:$0xff] }
0x1299   :  { %1465 = vmatpush.msrb.mxu1 %v1373_v3 }
0x129a   :  { %1278 = vrot.lane.b32.xlu2 %v1277_v4, %s1733_s8  ;;  %v1356_v4 = vld [vmem:[#allocation6 + $0x18] sm:$0xff] }
0x12dd   :  { %v1183_v45 = vpop.permute.xlu0 %1182 }
0x12de   :  { %v1185_v12 = vmul.f32 %v1183_v45, %v1165_v37  ;;  %v1365_v37 = vld [vmem:[#allocation6 + $0x60] sm:$0xff]  ;;  %v1372_v45 = vld [vmem:[#allocation6 + $0x98] sm:$0xff] }
0x12df   :  { %1437 = vmatpush.msrb.mxu0 %v1365_v37  ;;  %1466 = vmatpush.msrb.mxu1 %v1372_v45 }
0x12e0   :  { %1252 = vrot.lane.b32.xlu1 %v1185_v12, %s1733_s8 }
0x12e1   :  { %1438 = vmatpush.msrb.mxu0 %v1364_v46 }
0x12e3   :  { %1439 = vmatpush.msrb.mxu0 %v1363_v50 }
0x12e5   :  { %1440 = vmatpush.msrb.mxu0 %v1362_v53 }
0x12e7   :  { %1441 = vmatpush.msrb.mxu0 %v1361_v54 }
0x12e9   :  { %1442 = vmatpush.msrb.mxu0 %v1360_v56 }
0x12eb   :  { %1443 = vmatpush.msrb.mxu0 %v1359_v59 }
0x12f4   :  { %v1279_v51 = vpop.permute.xlu2 %1278 }
0x12f5   :  { %1534 = vmatmul.msk.f32.vlgmr.msra.gmra.mxu1 %vm113_vm5, %v1279_v51  ;;  %v1355_v51 = vld [vmem:[#allocation6 + $0x10] sm:$0xff] }
0x1352   :  { %v1253_v14 = vpop.permute.xlu1 %1252 }
0x1353   :  { %1533 = vmatmul.msk.f32.vlgmr.msra.gmra.mxu0 %vm113_vm5, %v1253_v14  ;;  %v1371_v14 = vld [vmem:[#allocation6 + $0x90] sm:$0xff] }
0x1354   :  { %1467 = vmatpush.msrb.mxu1 %v1371_v14 }
0x1372   :  { %v1299_v7 = vpop.f32.mrf.mxu1 }
0x13d0   :  { %v1273_v15 = vpop.f32.mrf.mxu0 }
0x13d1   :  { %v1300_v16 = vadd.f32 %v1299_v7, %v1273_v15  ;;  %v1354_v7 = vld [vmem:[#allocation6 + $0x8] sm:$0xff] }
0x13d2   :  { %v1370_v15 = vld [vmem:[#allocation6 + $0x88] sm:$0xff] }
0x13d3   :  { %v1302_v17 = vadd.f32 %v1300_v16, %v1870_v49  ;;  %1468 = vmatpush.msrb.mxu1 %v1370_v15  ;;  %v1353_v16 = vld [vmem:[#allocation6] sm:$0xff] }
0x13d5   :  { %v1535_v18 = vmul.f32 -1.442695, %v1302_v17  ;;  %v1369_v17 = vld [vmem:[#allocation6 + $0x80] sm:$0xff] }
0x13d6   :  { %1469 = vmatpush.msrb.mxu1 %v1369_v17 }
0x13d7   :  { %1642 = vpow2.f32 %v1535_v18  ;;  %v1549_v18 = vld [vmem:[#allocation4 + $0x40] ss:$0 sm:$0xff] }
0x13dd   :  { %v1643_v58 = vpop.eup %1642 }
0x13de   :  { %v1306_v19 = vadd.f32 1.0, %v1643_v58  ;;  %v1550_v58 = vld [vmem:[#allocation4 + $0x48] ss:$0 sm:$0xff] }
0x13e0   :  { %1644 = vrcp.f32 %v1306_v19  ;;  %v1318_v20 = vand.u32 2147483648, %v1306_v19  ;;  %v1316_v24 = vand.u32 2147483647, %v1306_v19  ;;  %vm1312_vm2 = vweird.f32 %v1306_v19 }
0x13e2   :  { %v1319_v26 = vor.u32 1.1754944e-38, %v1318_v20  ;;  %vm1317_vm4 = vcmp.eq.f32.partialorder %v1316_v24, 8.507059e+37  ;;  %v1551_v24 = vld [vmem:[#allocation6 + $0x100] ss:$0 sm:$0xff] }
0x13e6   :  { %v1645_v62 = vpop.eup %1644 }
0x13e7   :  { %v1308_v22 = vmul.f32 %v1645_v62, %v1306_v19  ;;  %vm1313_vm1 = vweird.f32 %v1645_v62 }
0x13e8   :  { %vm1314_vm3 = vmor %vm1312_vm2, %vm1313_vm1 }
0x13e9   :  { %v1309_v10 = vsub.f32 1.0, %v1308_v22 }
0x13eb   :  { %v1310_v23 = vmul.f32 %v1645_v62, %v1309_v10 }
0x13ed   :  { %v1311_v25 = vadd.f32 %v1645_v62, %v1310_v23 }
0x13ef   :  { %v1315_v13 = vsel %vm1314_vm3, %v1645_v62, %v1311_v25 }
0x13f0   :  { %v1320_v35 = vsel %vm1317_vm4, %v1319_v26, %v1315_v13 }
0x13f1   :  { %v1322_v49 = vmul.f32 2.0, %v1320_v35  ;;  %v1324_v40 = vmul.f32 %v1320_v35, %v1179_v61  ;;  %v1358_v61 = vld [vmem:[#allocation6 + $0x28] sm:$0xff] }
0x13f2   :  { %1444 = vmatpush.msrb.mxu0 %v1358_v61 }
0x13f3   :  { %v1536_v36 = vadd.f32 -1.0, %v1322_v49 }
0x13f4   :  { %1445 = vmatpush.msrb.mxu0 %v1357_v1 }
0x13f5   :  { %1326 = vrot.lane.b32.xlu0 %v1536_v36, %s1732_s7 }
0x13f6   :  { %1446 = vmatpush.msrb.mxu0 %v1356_v4 }
0x13f8   :  { %1447 = vmatpush.msrb.mxu0 %v1355_v51 }
0x13fa   :  { %1448 = vmatpush.msrb.mxu0 %v1354_v7 }
0x13fc   :  { %1449 = vmatpush.msrb.mxu0 %v1353_v16 }
0x1467   :  { %v1327_v38 = vpop.permute.xlu0 %1326 }
0x1468   :  { %v1329_v39 = vmul.f32 %v1327_v38, %v1320_v35 }
0x146a   :  { %1331 = vrot.lane.b32.xlu1 %v1329_v39, %s1733_s8 }
0x14dc   :  { %v1332_v42 = vpop.permute.xlu1 %1331 }
0x14dd   :  { %v1334_v21 = vadd.f32 %v1332_v42, %v1324_v40 }
0x14df   :  { %1646 = vtanh.f32 %v1334_v21 }
0x14e5   :  { %v1647_v41 = vpop.eup %1646 }
0x14e6   :  { %1337 = vrot.lane.b32.xlu2 %v1647_v41, %s1732_s7 }
0x1540   :  { %v1338_v29 = vpop.permute.xlu2 %1337 }
0x1541   :  { %v1340_v30 = vmul.f32 %v1338_v29, %v1320_v35 }
0x1543   :  { %1388 = vrot.lane.b32.xlu0 %v1340_v30, %s1733_s8 }
0x15b5   :  { %v1389_v12 = vpop.permute.xlu0 %1388 }
0x15b6   :  { %1537 = vmatmul.msk.f32.vlgmr.msra.gmra.mxu2 %vm113_vm5, %v1389_v12  ;;  %1538 = vmatmul.msk.f32.vlgmr.msrb.gmra.mxu3 %vm113_vm5, %v1389_v12 }
0x1639   :  { %v1409_v19 = vpop.f32.mrf.mxu2  ;;  %v1429_v62 = vpop.f32.mrf.mxu3 }
0x163a   :  { %v1410_v22 = vadd.f32 %v1549_v18, %v1409_v19  ;;  %v1430_v10 = vadd.f32 %v1550_v58, %v1429_v62 }
0x163c   :  { %v1432_v20 = vmax.f32 %v1410_v22, 0.0  ;;  %v1433_v23 = vmax.f32 %v1430_v10, 0.0 }
0x163e   :  { %1450 = vmatmul.f32.vlgmr.msrb.gmra.mxu0 %v1432_v20  ;;  %1470 = vmatmul.f32.vlgmr.msrb.gmra.mxu1 %v1433_v23 }
0x16bb   :  { %v1451_v25 = vpop.f32.mrf.mxu0  ;;  %v1471_v13 = vpop.f32.mrf.mxu1 }
0x16bc   :  { %v1452_v26 = vadd.f32 %v1551_v24, %v1451_v25 }
0x16be   :  { %v1472_v35 = vadd.f32 %v1471_v13, %v1452_v26 }
0x16c0   :  { %1474 = vst [vmem:[%s2078_s4] sm:$0x3] %v1472_v35 }
0x16c1   :  { %1479 = vsyncpa [#allocation3], 1 }
0x16c2   :  { %1480 = vsyncpa [#allocation5], 1 }

</bundles_post_ra>
